<compile_context>
chip_gen: v6e
topology: v6e:2x2x1
jax: 0.10.0
libtpu: 0.0.40
codegen_flags: <defaults>
</compile_context>

<pallas_src>
import functools

import jax
import jax.numpy as jnp
from jax.experimental import pallas as pl
from jax.experimental.pallas import tpu as pltpu


def _patch_expand_kernel(x_ref, w_ref, g_ref, b_ref, o_ref, *, eps):
    # x_ref: (th, W, D)      input pixels for this band of H-rows
    # w_ref: (2, D, D)       w_ref[p1] = W_expand[p1*D:(p1+1)*D, :].T
    # g_ref: (1, c), b_ref: (1, c)   LayerNorm affine params, c = D // 2
    # o_ref: (th, 2, W, D)   output band; last dim packs the two p2 halves
    th, W, D = x_ref.shape
    c = D // 2
    R = th * W

    x2 = x_ref[...].reshape(R, D)               # (R, D) flat pixel rows
    gamma = g_ref[...]                          # (1, c)
    beta = b_ref[...]                           # (1, c)

    for p1 in range(2):                         # unrolled: 2 MXU matmuls / tile
        # y[:, p2*c + cc] == (x @ W_expand.T)[:, (2*p1 + p2)*c + cc]
        y = jnp.dot(x2, w_ref[p1], preferred_element_type=jnp.float32)  # (R, D)
        halves = []
        for p2 in range(2):                     # LayerNorm over each quarter (size c)
            h = y[:, p2 * c:(p2 + 1) * c]
            mu = jnp.mean(h, axis=-1, keepdims=True)
            var = jnp.mean(jnp.square(h - mu), axis=-1, keepdims=True)
            hn = (h - mu) * jax.lax.rsqrt(var + eps)
            halves.append(hn * gamma + beta)
        out_p1 = jnp.concatenate(halves, axis=-1).astype(o_ref.dtype)   # (R, D)
        # Lane-dense store of the whole (h, p1, :, :) sub-band.
        o_ref[:, p1:p1 + 1, :, :] = out_p1.reshape(th, 1, W, D)


def patch_expand(x, w_expand, gamma, beta, *, eps=1e-5,
                 vmem_act_budget=20 * 1024 * 1024):
    """PatchExpand forward (dim_scale=2, LayerNorm(dim//2)).

    x:        (B, H, W, D) float32
    w_expand: (2*D, D)     nn.Linear(dim, 2*dim, bias=False).weight
    gamma:    (D//2,)      LayerNorm weight
    beta:     (D//2,)      LayerNorm bias
    returns   (B, 2*H, 2*W, D//2)
    """
    B, H, W, D = x.shape
    assert D % 2 == 0 and w_expand.shape == (2 * D, D)
    c = D // 2
    nb = B * H                                    # number of (b, h) bands
    itemsize = jnp.dtype(x.dtype).itemsize

    # Double-buffered VMEM per band-row: input W*D (x2) + output 2*W*D (x2).
    bytes_per_row = 6 * W * D * itemsize
    th = max(1, min(nb, vmem_act_budget // max(bytes_per_row, 1)))
    if nb > 1:
        th = min(th, pl.cdiv(nb, 2))              # >= 2 steps -> megacore sharding
    grid_m = pl.cdiv(nb, th)                      # ragged tail handled by masking

    x3 = x.reshape(nb, W, D)                                    # free reshape
    # (2D, D) -> (2, D, D) with wt[p1] = W_expand[p1*D:(p1+1)*D, :].T
    wt = jnp.transpose(w_expand.reshape(2, D, D), (0, 2, 1))
    g2 = gamma.reshape(1, c)
    b2 = beta.reshape(1, c)

    kernel = functools.partial(_patch_expand_kernel, eps=eps)

    n_pix = nb * W
    cost = pl.CostEstimate(
        flops=4 * n_pix * D * D,                  # 2 matmuls of (R,D)x(D,D)
        transcendentals=4 * n_pix,                # one rsqrt per output pixel
        bytes_accessed=(3 * n_pix * D + 2 * D * D + 2 * c) * itemsize,
    )

    out4 = pl.pallas_call(
        kernel,
        out_shape=jax.ShapeDtypeStruct((nb, 2, W, D), x.dtype),
        grid_spec=pltpu.PrefetchScalarGridSpec(
            num_scalar_prefetch=0,
            grid=(grid_m,),
            in_specs=[
                pl.BlockSpec((th, W, D), lambda i: (i, 0, 0)),    # x band
                pl.BlockSpec((2, D, D), lambda i: (0, 0, 0)),     # weight (VMEM-resident)
                pl.BlockSpec((1, c), lambda i: (0, 0)),           # gamma  (VMEM-resident)
                pl.BlockSpec((1, c), lambda i: (0, 0)),           # beta   (VMEM-resident)
            ],
            out_specs=pl.BlockSpec((th, 2, W, D), lambda i: (i, 0, 0, 0)),
        ),
        compiler_params=pltpu.CompilerParams(
            dimension_semantics=("parallel",),
        ),
        cost_estimate=cost,
    )(x3, wt, g2, b2)

    # (nb, 2, W, D) row-major == (B, 2H, 2W, c) row-major: pure metadata reshape.
    return out4.reshape(B, 2 * H, 2 * W, c)


if __name__ == "__main__":
    key = jax.random.PRNGKey(0)
    kx, kw, kg, kb = jax.random.split(key, 4)

    # Small shapes consistent with the module: x is (B, H, W, dim).
    B, H, W, dim = 2, 8, 8, 64
    c = dim // 2

    x = jax.random.normal(kx, (B, H, W, dim), dtype=jnp.float32)
    w_expand = jax.random.normal(kw, (2 * dim, dim), dtype=jnp.float32) * (
        1.0 / jnp.sqrt(dim)
    )
    gamma = 1.0 + 0.1 * jax.random.normal(kg, (c,), dtype=jnp.float32)
    beta = 0.1 * jax.random.normal(kb, (c,), dtype=jnp.float32)

    out = patch_expand(x, w_expand, gamma, beta)
    out = jax.block_until_ready(out)

    # Pure-JAX reference: Linear -> einops rearrange -> LayerNorm.
    y = jnp.einsum(
        "bhwd,ed->bhwe", x, w_expand, precision=jax.lax.Precision.HIGHEST
    )
    y = y.reshape(B, H, W, 2, 2, c).transpose(0, 1, 3, 2, 4, 5)
    y = y.reshape(B, 2 * H, 2 * W, c)
    mu = y.mean(axis=-1, keepdims=True)
    var = jnp.mean(jnp.square(y - mu), axis=-1, keepdims=True)
    ref = (y - mu) * jax.lax.rsqrt(var + 1e-5) * gamma + beta

    assert out.shape == (B, 2 * H, 2 * W, c)
    assert jnp.allclose(out, ref, atol=1e-4, rtol=1e-4)
    print("KERNEL_OK")
</pallas_src>

<mosaic_0001>
module attributes {stable_mosaic.version = 11 : i64} {
  func.func @_patch_expand_kernel(%arg0: i32, %arg1: memref<8x8x64xf32, #tpu.memory_space<vmem>>, %arg2: memref<2x64x64xf32, #tpu.memory_space<vmem>>, %arg3: memref<1x32xf32, #tpu.memory_space<vmem>>, %arg4: memref<1x32xf32, #tpu.memory_space<vmem>>, %arg5: memref<8x2x8x64xf32, #tpu.memory_space<vmem>>) attributes {dimension_semantics = [#tpu.dimension_semantics<parallel>], iteration_bounds = array<i64: 2>, scalar_prefetch = 0 : i64, scratch_operands = 0 : i64, tpu.core_type = #tpu.core_type<tc>, window_params = [{transform_indices = @transform_0, window_bounds = array<i64: 8, 8, 64>}, {pipeline_mode = #tpu.pipeline_mode<synchronous>, transform_indices = @transform_1, window_bounds = array<i64: 2, 64, 64>}, {pipeline_mode = #tpu.pipeline_mode<synchronous>, transform_indices = @transform_2, window_bounds = array<i64: 1, 32>}, {pipeline_mode = #tpu.pipeline_mode<synchronous>, transform_indices = @transform_3, window_bounds = array<i64: 1, 32>}, {transform_indices = @transform_4, window_bounds = array<i64: 8, 2, 8, 64>}]} {
    %c0 = arith.constant 0 : index
    %c0_0 = arith.constant 0 : index
    %c0_1 = arith.constant 0 : index
    %0 = vector.load %arg1[%c0, %c0_0, %c0_1] : memref<8x8x64xf32, #tpu.memory_space<vmem>>, vector<8x8x64xf32>
    %1 = vector.shape_cast %0 : vector<8x8x64xf32> to vector<64x64xf32>
    %c0_2 = arith.constant 0 : index
    %c0_3 = arith.constant 0 : index
    %2 = vector.load %arg3[%c0_2, %c0_3] : memref<1x32xf32, #tpu.memory_space<vmem>>, vector<1x32xf32>
    %c0_4 = arith.constant 0 : index
    %c0_5 = arith.constant 0 : index
    %3 = vector.load %arg4[%c0_4, %c0_5] : memref<1x32xf32, #tpu.memory_space<vmem>>, vector<1x32xf32>
    %c0_6 = arith.constant 0 : index
    %c0_7 = arith.constant 0 : index
    %c0_8 = arith.constant 0 : index
    %4 = vector.load %arg2[%c0_6, %c0_7, %c0_8] : memref<2x64x64xf32, #tpu.memory_space<vmem>>, vector<1x64x64xf32>
    %5 = vector.shape_cast %4 : vector<1x64x64xf32> to vector<64x64xf32>
    %cst = arith.constant dense<0.000000e+00> : vector<64x64xf32>
    %6 = tpu.matmul %1, %5, %cst {dimension_numbers = #tpu.dot_dimension_numbers<[1], [0], [0], [1], [0, 0, 1, 1], [], []>} : vector<64x64xf32>, vector<64x64xf32>, vector<64x64xf32> -> vector<64x64xf32>
    %7 = vector.extract_strided_slice %6 {offsets = [0, 0], sizes = [64, 32], strides = [1, 1]} : vector<64x64xf32> to vector<64x32xf32>
    %cst_9 = arith.constant dense<0.000000e+00> : vector<64xf32>
    %8 = vector.multi_reduction <add>, %7, %cst_9 [1] : vector<64x32xf32> to vector<64xf32>
    %9 = vector.shape_cast %8 : vector<64xf32> to vector<64x1xf32>
    %cst_10 = arith.constant 3.200000e+01 : f32
    %10 = vector.broadcast %cst_10 : f32 to vector<64x1xf32>
    %11 = arith.divf %9, %10 : vector<64x1xf32>
    %12 = vector.broadcast %11 : vector<64x1xf32> to vector<64x32xf32>
    %13 = arith.subf %7, %12 : vector<64x32xf32>
    %14 = arith.mulf %13, %13 : vector<64x32xf32>
    %cst_11 = arith.constant dense<0.000000e+00> : vector<64xf32>
    %15 = vector.multi_reduction <add>, %14, %cst_11 [1] : vector<64x32xf32> to vector<64xf32>
    %16 = vector.shape_cast %15 : vector<64xf32> to vector<64x1xf32>
    %cst_12 = arith.constant 3.200000e+01 : f32
    %17 = vector.broadcast %cst_12 : f32 to vector<64x1xf32>
    %18 = arith.divf %16, %17 : vector<64x1xf32>
    %19 = vector.broadcast %11 : vector<64x1xf32> to vector<64x32xf32>
    %20 = arith.subf %7, %19 : vector<64x32xf32>
    %cst_13 = arith.constant 9.99999974E-6 : f32
    %21 = vector.broadcast %cst_13 : f32 to vector<64x1xf32>
    %22 = arith.addf %18, %21 : vector<64x1xf32>
    %23 = math.rsqrt %22 : vector<64x1xf32>
    %24 = vector.broadcast %23 : vector<64x1xf32> to vector<64x32xf32>
    %25 = arith.mulf %20, %24 : vector<64x32xf32>
    %26 = vector.broadcast %2 : vector<1x32xf32> to vector<64x32xf32>
    %27 = arith.mulf %25, %26 : vector<64x32xf32>
    %28 = vector.broadcast %3 : vector<1x32xf32> to vector<64x32xf32>
    %29 = arith.addf %27, %28 : vector<64x32xf32>
    %30 = vector.extract_strided_slice %6 {offsets = [0, 32], sizes = [64, 32], strides = [1, 1]} : vector<64x64xf32> to vector<64x32xf32>
    %cst_14 = arith.constant dense<0.000000e+00> : vector<64xf32>
    %31 = vector.multi_reduction <add>, %30, %cst_14 [1] : vector<64x32xf32> to vector<64xf32>
    %32 = vector.shape_cast %31 : vector<64xf32> to vector<64x1xf32>
    %cst_15 = arith.constant 3.200000e+01 : f32
    %33 = vector.broadcast %cst_15 : f32 to vector<64x1xf32>
    %34 = arith.divf %32, %33 : vector<64x1xf32>
    %35 = vector.broadcast %34 : vector<64x1xf32> to vector<64x32xf32>
    %36 = arith.subf %30, %35 : vector<64x32xf32>
    %37 = arith.mulf %36, %36 : vector<64x32xf32>
    %cst_16 = arith.constant dense<0.000000e+00> : vector<64xf32>
    %38 = vector.multi_reduction <add>, %37, %cst_16 [1] : vector<64x32xf32> to vector<64xf32>
    %39 = vector.shape_cast %38 : vector<64xf32> to vector<64x1xf32>
    %cst_17 = arith.constant 3.200000e+01 : f32
    %40 = vector.broadcast %cst_17 : f32 to vector<64x1xf32>
    %41 = arith.divf %39, %40 : vector<64x1xf32>
    %42 = vector.broadcast %34 : vector<64x1xf32> to vector<64x32xf32>
    %43 = arith.subf %30, %42 : vector<64x32xf32>
    %cst_18 = arith.constant 9.99999974E-6 : f32
    %44 = vector.broadcast %cst_18 : f32 to vector<64x1xf32>
    %45 = arith.addf %41, %44 : vector<64x1xf32>
    %46 = math.rsqrt %45 : vector<64x1xf32>
    %47 = vector.broadcast %46 : vector<64x1xf32> to vector<64x32xf32>
    %48 = arith.mulf %43, %47 : vector<64x32xf32>
    %49 = vector.broadcast %2 : vector<1x32xf32> to vector<64x32xf32>
    %50 = arith.mulf %48, %49 : vector<64x32xf32>
    %51 = vector.broadcast %3 : vector<1x32xf32> to vector<64x32xf32>
    %52 = arith.addf %50, %51 : vector<64x32xf32>
    %53 = tpu.concatenate %29, %52 in 1 : vector<64x32xf32>, vector<64x32xf32> -> vector<64x64xf32>
    %54 = vector.shape_cast %53 : vector<64x64xf32> to vector<8x1x8x64xf32>
    %c0_19 = arith.constant 0 : index
    %c0_20 = arith.constant 0 : index
    %c0_21 = arith.constant 0 : index
    %c0_22 = arith.constant 0 : index
    %55 = vector.load %arg5[%c0_19, %c0_20, %c0_21, %c0_22] : memref<8x2x8x64xf32, #tpu.memory_space<vmem>>, vector<8x1x8x64xf32>
    tpu.vector_store %arg5[%c0_19, %c0_20, %c0_21, %c0_22], %54 {strides = array<i32>} : memref<8x2x8x64xf32, #tpu.memory_space<vmem>>, vector<8x1x8x64xf32>,
    %c1 = arith.constant 1 : index
    %c0_23 = arith.constant 0 : index
    %c0_24 = arith.constant 0 : index
    %56 = vector.load %arg2[%c1, %c0_23, %c0_24] : memref<2x64x64xf32, #tpu.memory_space<vmem>>, vector<1x64x64xf32>
    %57 = vector.shape_cast %56 : vector<1x64x64xf32> to vector<64x64xf32>
    %cst_25 = arith.constant dense<0.000000e+00> : vector<64x64xf32>
    %58 = tpu.matmul %1, %57, %cst_25 {dimension_numbers = #tpu.dot_dimension_numbers<[1], [0], [0], [1], [0, 0, 1, 1], [], []>} : vector<64x64xf32>, vector<64x64xf32>, vector<64x64xf32> -> vector<64x64xf32>
    %59 = vector.extract_strided_slice %58 {offsets = [0, 0], sizes = [64, 32], strides = [1, 1]} : vector<64x64xf32> to vector<64x32xf32>
    %cst_26 = arith.constant dense<0.000000e+00> : vector<64xf32>
    %60 = vector.multi_reduction <add>, %59, %cst_26 [1] : vector<64x32xf32> to vector<64xf32>
    %61 = vector.shape_cast %60 : vector<64xf32> to vector<64x1xf32>
    %cst_27 = arith.constant 3.200000e+01 : f32
    %62 = vector.broadcast %cst_27 : f32 to vector<64x1xf32>
    %63 = arith.divf %61, %62 : vector<64x1xf32>
    %64 = vector.broadcast %63 : vector<64x1xf32> to vector<64x32xf32>
    %65 = arith.subf %59, %64 : vector<64x32xf32>
    %66 = arith.mulf %65, %65 : vector<64x32xf32>
    %cst_28 = arith.constant dense<0.000000e+00> : vector<64xf32>
    %67 = vector.multi_reduction <add>, %66, %cst_28 [1] : vector<64x32xf32> to vector<64xf32>
    %68 = vector.shape_cast %67 : vector<64xf32> to vector<64x1xf32>
    %cst_29 = arith.constant 3.200000e+01 : f32
    %69 = vector.broadcast %cst_29 : f32 to vector<64x1xf32>
    %70 = arith.divf %68, %69 : vector<64x1xf32>
    %71 = vector.broadcast %63 : vector<64x1xf32> to vector<64x32xf32>
    %72 = arith.subf %59, %71 : vector<64x32xf32>
    %cst_30 = arith.constant 9.99999974E-6 : f32
    %73 = vector.broadcast %cst_30 : f32 to vector<64x1xf32>
    %74 = arith.addf %70, %73 : vector<64x1xf32>
    %75 = math.rsqrt %74 : vector<64x1xf32>
    %76 = vector.broadcast %75 : vector<64x1xf32> to vector<64x32xf32>
    %77 = arith.mulf %72, %76 : vector<64x32xf32>
    %78 = vector.broadcast %2 : vector<1x32xf32> to vector<64x32xf32>
    %79 = arith.mulf %77, %78 : vector<64x32xf32>
    %80 = vector.broadcast %3 : vector<1x32xf32> to vector<64x32xf32>
    %81 = arith.addf %79, %80 : vector<64x32xf32>
    %82 = vector.extract_strided_slice %58 {offsets = [0, 32], sizes = [64, 32], strides = [1, 1]} : vector<64x64xf32> to vector<64x32xf32>
    %cst_31 = arith.constant dense<0.000000e+00> : vector<64xf32>
    %83 = vector.multi_reduction <add>, %82, %cst_31 [1] : vector<64x32xf32> to vector<64xf32>
    %84 = vector.shape_cast %83 : vector<64xf32> to vector<64x1xf32>
    %cst_32 = arith.constant 3.200000e+01 : f32
    %85 = vector.broadcast %cst_32 : f32 to vector<64x1xf32>
    %86 = arith.divf %84, %85 : vector<64x1xf32>
    %87 = vector.broadcast %86 : vector<64x1xf32> to vector<64x32xf32>
    %88 = arith.subf %82, %87 : vector<64x32xf32>
    %89 = arith.mulf %88, %88 : vector<64x32xf32>
    %cst_33 = arith.constant dense<0.000000e+00> : vector<64xf32>
    %90 = vector.multi_reduction <add>, %89, %cst_33 [1] : vector<64x32xf32> to vector<64xf32>
    %91 = vector.shape_cast %90 : vector<64xf32> to vector<64x1xf32>
    %cst_34 = arith.constant 3.200000e+01 : f32
    %92 = vector.broadcast %cst_34 : f32 to vector<64x1xf32>
    %93 = arith.divf %91, %92 : vector<64x1xf32>
    %94 = vector.broadcast %86 : vector<64x1xf32> to vector<64x32xf32>
    %95 = arith.subf %82, %94 : vector<64x32xf32>
    %cst_35 = arith.constant 9.99999974E-6 : f32
    %96 = vector.broadcast %cst_35 : f32 to vector<64x1xf32>
    %97 = arith.addf %93, %96 : vector<64x1xf32>
    %98 = math.rsqrt %97 : vector<64x1xf32>
    %99 = vector.broadcast %98 : vector<64x1xf32> to vector<64x32xf32>
    %100 = arith.mulf %95, %99 : vector<64x32xf32>
    %101 = vector.broadcast %2 : vector<1x32xf32> to vector<64x32xf32>
    %102 = arith.mulf %100, %101 : vector<64x32xf32>
    %103 = vector.broadcast %3 : vector<1x32xf32> to vector<64x32xf32>
    %104 = arith.addf %102, %103 : vector<64x32xf32>
    %105 = tpu.concatenate %81, %104 in 1 : vector<64x32xf32>, vector<64x32xf32> -> vector<64x64xf32>
    %106 = vector.shape_cast %105 : vector<64x64xf32> to vector<8x1x8x64xf32>
    %c0_36 = arith.constant 0 : index
    %c1_37 = arith.constant 1 : index
    %c0_38 = arith.constant 0 : index
    %c0_39 = arith.constant 0 : index
    %107 = vector.load %arg5[%c0_36, %c1_37, %c0_38, %c0_39] : memref<8x2x8x64xf32, #tpu.memory_space<vmem>>, vector<8x1x8x64xf32>
    tpu.vector_store %arg5[%c0_36, %c1_37, %c0_38, %c0_39], %106 {strides = array<i32>} : memref<8x2x8x64xf32, #tpu.memory_space<vmem>>, vector<8x1x8x64xf32>,
    return
  }
  func.func @transform_0(%arg0: i32) -> (i32, i32, i32) {
    %c0_i32 = arith.constant 0 : i32
    %c0_i32_0 = arith.constant 0 : i32
    %c0_i32_1 = arith.constant 0 : i32
    return %arg0, %c0_i32, %c0_i32_0 : i32, i32, i32
  }
  func.func @transform_1(%arg0: i32) -> (i32, i32, i32) {
    %c0_i32 = arith.constant 0 : i32
    %c0_i32_0 = arith.constant 0 : i32
    %c0_i32_1 = arith.constant 0 : i32
    %c0_i32_2 = arith.constant 0 : i32
    return %c0_i32, %c0_i32_0, %c0_i32_1 : i32, i32, i32
  }
  func.func @transform_2(%arg0: i32) -> (i32, i32) {
    %c0_i32 = arith.constant 0 : i32
    %c0_i32_0 = arith.constant 0 : i32
    %c0_i32_1 = arith.constant 0 : i32
    return %c0_i32, %c0_i32_0 : i32, i32
  }
  func.func @transform_3(%arg0: i32) -> (i32, i32) {
    %c0_i32 = arith.constant 0 : i32
    %c0_i32_0 = arith.constant 0 : i32
    %c0_i32_1 = arith.constant 0 : i32
    return %c0_i32, %c0_i32_0 : i32, i32
  }
  func.func @transform_4(%arg0: i32) -> (i32, i32, i32, i32) {
    %c0_i32 = arith.constant 0 : i32
    %c0_i32_0 = arith.constant 0 : i32
    %c0_i32_1 = arith.constant 0 : i32
    %c0_i32_2 = arith.constant 0 : i32
    return %arg0, %c0_i32, %c0_i32_0, %c0_i32_1 : i32, i32, i32, i32
  }
}

</mosaic_0001>

<bundles_post_ra>
// kernel: tpu_custom_call.1
= control target key start
LH: loop header
LB: loop body
LE: loop exit
PB: predicated region body
PF: predicated region fallthrough
CT: control target
= control target key end

     0   :  { %9 = vsyncpa [#allocation3], 0  ;;  %s2468_s0 = inlined_call_operand.hbm [shape: f32[16,8,64], index: 0, kind: input, shape index: {}]   ;;  %s2469_s1 = inlined_call_operand.hbm [shape: f32[2,64,64], index: 1, kind: input, shape index: {}]   ;;  %s2470_s2 = inlined_call_operand.vmem [shape: f32[1,32], index: 2, kind: input, shape index: {}]   ;;  %s2471_s3 = inlined_call_operand.vmem [shape: f32[1,32], index: 3, kind: input, shape index: {}]   ;;  %s2472_s4 = inlined_call_operand.hbm [shape: f32[16,2,8,64], index: 4, kind: output, shape index: {}]  }
   0x1   :  { %11 = vsyncpa [#allocation3 + $0x1], 0 }
   0x2   :  { %12 = vsyncpa [#allocation6], 0 }
   0x3   :  { %13 = vsyncpa [#allocation4], 0 }
   0x4   :  { %15 = vsyncpa [#allocation4 + $0x1], 0  ;;  %s1673_s15 = smov 0   ;;  %s1675_s16 = smov 0  }
   0x5   :  { %s1677_s17 = smov 0   ;;  %s1679_s18 = smov 0  }
   0x6 LB: > { %s1694_s19 = sadd.s32 4294967295, %s1637_s18   ;;  %s1254_s20 = sadd.s32 4294967294, %s1637_s18   ;;  %s1637_s18 = sphi %s1679_s18, %s2515_s18   ;;  %s1633_s17 = sphi %s1677_s17, %s2514_s17   ;;  %s1629_s16 = sphi %s1675_s16, %s2513_s16   ;;  %s1625_s15 = sphi %s1673_s15, %s2512_s15  }
   0x7   : > { %p41_p0 = scmp.ne.s32.totalorder %s1629_s16, %s1625_s15  ;;  %p2473_p1 = scmp.eq.s32.totalorder %s1694_s19, 0 }
   0x8   : > { %p134_p3 = scmp.eq.s32.totalorder %s1254_s20, 1  ;;  %p1255_p5 = scmp.ge.s32.totalorder %s1637_s18, 1 }
   0x9   : > { %p1703_p4 = por %p2473_p1, %p41_p0  ;;  %p141_p7 = scmp.lt.s32.totalorder %s1637_s18, 3 }
   0xa   : > { %p1708_p6 = por %p134_p3, %p41_p0  ;;  %s1639_s24 = smov [#allocation5]  }
   0xb   : > { %s2484_s21 = scalar_select %p1703_p4, 1, 0 }
   0xc   : > { %s2485_s22 = scalar_select %p1708_p6, 1, 0 }
   0xd   : > { %p1713_p8 = pnand %p1255_p5, %p141_p7  ;;  %s153_s25 = sshll.u32 %s1639_s24, 4  ;;  %s154_s25 = int_to_ptr.vmem [resolvable:$true] %s153_s25 }
   0xe   : > { %s1727_s27 = sadd.s32 1, %s1637_s18   ;;  %s28_s28 = sadd.s32 1, %s1633_s17 }
   0xf   : > { %s2486_s23 = scalar_select %p1713_p8, 1, 0 }
  0x10   : > { %p1396_p9 = pneg %p1713_p8  ;;  %s25_s29 = ssub.s32 %s1637_s18, %s1727_s27 }
  0x11   : > { %s1526_s30 = scalar_lea.vmem %s154_s25, 2048  ;;  %p1534_p5 = scmp.lt.s32.totalorder %s154_s25, %s154_s25 }
  0x12   : > { %p1722_p11 = pnand %p1396_p9, %p2473_p1  ;;  %p1527_p13 = scmp.ne.s32.totalorder %s154_s25, %s1526_s30 }
  0x13   : > { %p1535_p7 = scmp.lt.s32.totalorder %s1526_s30, %s1526_s30 }
  0x14   : > { %p1517_p12 = pneg %p1722_p11 }
  0x15   : > { %p1536_p10 = por %p1535_p7, %p1534_p5 }
  0x16   : > { %p1529_p0 = pnand %p1527_p13, %p1517_p12 }
  0x18   : > { %p1530_p3 = pneg %p1529_p0 }
  0x1a   : > { %p1537_p2 = pnand %p1536_p10, %p1530_p3 }
  0x1c   : > { %1540 = shalt.err (!%p1537_p2)
}
  0x1d   : > { %s1640_s5 = smov 128   ;;  %s1641_s6 = smov 8  }
  0x1e   : > { %1399 = dma.hbm_to_vmem [thread:$0]  (!%p1722_p11), %s2469_s1, 2048, %s154_s25, [#allocation6], %s1640_s5, %s1640_s5, %s1641_s6  }
  0x1f   : > { %p26_p2 = scmp.eq.s32.totalorder %s25_s29, 0  ;;  %p35_p9 = scmp.ne.s32.totalorder %s1633_s17, %s1629_s16 }
  0x20   : > { %p36_p10 = scmp.eq.s32.totalorder %s1637_s18, 0  ;;  %p1409_p12 = scmp.lt.s32.totalorder %s1637_s18, 2 }
  0x21   : > { %s1747_s9 = scalar_select %p26_p2, %s1633_s17, %s28_s28  }
  0x22   : > { %p37_p13 = por %p36_p10, %p35_p9  ;;  %p2488_p0 = scmp.eq.s32.totalorder %s1694_s19, 1 }
  0x23   : > { %s173_s11 = sand.u32 1, %s1633_s17   ;;  %s1297_s12 = sshll.u32 %s1637_s18, 10 }
  0x24   : > { %p1751_p3 = por %p2488_p0, %p35_p9  ;;  %s1258_s13 = sshll.u32 %s173_s11, 6 }
  0x25   : > { %s1760_s24 = scalar_lea.hbm %s2468_s0, %s1297_s12  ;;  %s177_s25 = scalar_lea.vmem [#allocation2], %s1258_s13 }
  0x26   : > { %s2489_s10 = scalar_select %p1751_p3, 1, 0 }
  0x27   : > { %s184_s26 = sshll.u32 %s177_s25, 4  ;;  %p1762_p11 = pnand %p1409_p12, %p37_p13  ;;  %s1766_s26 = int_to_ptr.vmem [resolvable:$true] %s184_s26 }
  0x28   : > { %s1768_s29 = scalar_lea.sflag [#allocation3], %s173_s11  ;;  %s1541_s30 = scalar_lea.hbm %s1760_s24, 1024 }
  0x29   : > { %p1542_p5 = scmp.ne.s32.totalorder %s1760_s24, %s1541_s30  ;;  %p1543_p7 = pneg %p1762_p11 }
  0x2a   : > { %s1546_s12 = scalar_lea.hbm %s2468_s0, 2048  ;;  %p1547_p10 = scmp.lt.s32.totalorder %s1760_s24, %s2468_s0 }
  0x2b   : > { %p1544_p2 = pnand %p1543_p7, %p1542_p5  ;;  %p1548_p12 = scmp.lt.s32.totalorder %s1546_s12, %s1541_s30 }
  0x2d   : > { %p1545_p9 = pneg %p1544_p2  ;;  %p1549_p13 = por %p1548_p12, %p1547_p10 }
  0x2f   : > { %p1550_p0 = pnand %p1549_p13, %p1545_p9 }
  0x31   : > { %1553 = shalt.err (!%p1550_p0)
}
  0x32   : > { %s1554_s11 = scalar_lea.vmem %s1766_s26, 1024  ;;  %s1642_s20 = smov [#allocation2]  }
  0x33   : > { %p1555_p1 = scmp.ne.s32.totalorder %s1766_s26, %s1554_s11  ;;  %s1559_s25 = sshll.u32 %s1642_s20, 4  ;;  %s1560_s25 = int_to_ptr.vmem [resolvable:$false] %s1559_s25 }
  0x34   : > { %s1561_s7 = scalar_lea.vmem %s1560_s25, 2048  ;;  %p1562_p2 = scmp.lt.s32.totalorder %s1766_s26, %s1560_s25 }
  0x35   : > { %p1557_p6 = pnand %p1555_p1, %p1543_p7  ;;  %p1563_p3 = scmp.lt.s32.totalorder %s1561_s7, %s1554_s11 }
  0x37   : > { %p1558_p5 = pneg %p1557_p6  ;;  %p1564_p4 = por %p1563_p3, %p1562_p2 }
  0x39   : > { %p1565_p8 = pnand %p1564_p4, %p1558_p5 }
  0x3b   : > { %1568 = shalt.err (!%p1565_p8)
}
  0x3c   : > { %1403 = dma.hbm_to_vmem [thread:$0]  (!%p1762_p11), %s1760_s24, 1024, %s1766_s26, %s1768_s29, %s1640_s5, %s1640_s5, %s1641_s6  }
  0x3d   : > { %p2491_p1 = scmp.ne.s32.totalorder %s2486_s23, 0 }
  0x3f   : > { %196 = sbr.rel (%p2491_p1) target bundleno = 1087 (0x43f), region = 36 }
  0x44   : > { %s1795_s30 = sand.u32 1, %s1629_s16   ;;  %p2492_p4 = scmp.ne.s32.totalorder %s2484_s21, 0 }
  0x45   : > { %s1262_s8 = sshll.u32 %s1795_s30, 6  ;;  %s199_s12 = scalar_lea.sflag [#allocation3], %s1795_s30 }
  0x46   : > { %s1799_s13 = scalar_lea.vmem [#allocation2], %s1262_s8 }
  0x47   : > { %1612 = dma.done.wait (%p2492_p4), %s199_s12, 1024  }
  0x48   : > { %1614 = vsyncadd (%p2492_p4), %s199_s12, 4294966272  ;;  %p2493_p6 = scmp.eq.s32.totalorder %s1694_s19, 0 }
  0x4a   : > { %1616 = dma.done.wait (%p2493_p6), [#allocation6], 2048   ;;  %p2494_p8 = pmov %p2493_p6 }
  0x4b   : > { %v250_v0 = vld [vmem:[#allocation5 + $0x38] sm:$0xff]  ;;  %v249_v1 = vld [vmem:[#allocation5 + $0x30] sm:$0xff]  ;;  %v248_v4 = vld [vmem:[#allocation5 + $0x28] sm:$0xff]  ;;  %vm251_vm0 = vcmask 523264   ;;  %s1643_s21 = smov 96   ;;  %vm381_vm1 = vcmask 261120  }
  0x4c   : > { %1618 = vsyncadd (%p2494_p8), [#allocation6], 4294965248  ;;  %v729_v2 = vld [vmem:[#allocation5 + $0x78] sm:$0xff]  ;;  %1332 = vmatprep.subr.mxu0 %v250_v0  ;;  %v728_v3 = vld [vmem:[#allocation5 + $0x70] sm:$0xff]  ;;  %s1644_s6 = smov 32   ;;  %s1264_s28 = sshll.u32 %s1795_s30, 7 }
  0x4d   : > { %1360 = vmatprep.subr.mxu1 %v729_v2  ;;  %1333 = vmatpush3.msra.mxu0 %v250_v0  ;;  %v727_v5 = vld [vmem:[#allocation5 + $0x68] sm:$0xff]  ;;  %v247_v6 = vld [vmem:[#allocation5 + $0x20] sm:$0xff]  ;;  %v246_v8 = vld [vmem:[#allocation5 + $0x18] sm:$0xff]  ;;  %s2347_s29 = scalar_lea.vmem [#allocation7], %s1264_s28  ;;  %s1299_s14 = sshll.u32 %s1694_s19, 11 }
  0x4e   : > { %1361 = vmatpush3.msra.mxu1 %v729_v2  ;;  %1334 = vmatprep.subr.mxu0 %v249_v1  ;;  %v726_v7 = vld [vmem:[#allocation5 + $0x60] sm:$0xff]  ;;  %v725_v9 = vld [vmem:[#allocation5 + $0x58] sm:$0xff]  ;;  %v245_v10 = vld [vmem:[#allocation5 + $0x10] sm:$0xff]  ;;  %s1171_s11 = sshll.u32 %s2347_s29, 4  ;;  %s2420_s7 = scalar_lea.hbm %s2472_s4, %s1299_s14  ;;  %s2422_s11 = int_to_ptr.vmem [resolvable:$true] %s1171_s11 }
  0x4f   : > { %1362 = vmatprep.subr.mxu1 %v728_v3  ;;  %1335 = vmatpush3.msra.mxu0 %v249_v1  ;;  %v724_v11 = vld [vmem:[#allocation5 + $0x50] sm:$0xff]  ;;  %v244_v12 = vld [vmem:[#allocation5 + $0x8] sm:$0xff]  ;;  %v233_v14 = vld [vmem:[%s1799_s13] sm:$0xff]  ;;  %s1157_s19 = scalar_lea.sflag [#allocation4], %s1795_s30  ;;  %s1569_s8 = scalar_lea.vmem %s2422_s11, 2048 }
  0x50   : > { %1363 = vmatpush3.msra.mxu1 %v728_v3  ;;  %1336 = vmatprep.subr.mxu0 %v248_v4  ;;  %v723_v13 = vld [vmem:[#allocation5 + $0x48] sm:$0xff]  ;;  %v243_v15 = vld [vmem:[#allocation5] sm:$0xff]  ;;  %v235_v18 = vld [vmem:[%s1799_s13 + $0x10] sm:$0xff]  ;;  %p1570_p3 = scmp.ne.s32.totalorder %s2422_s11, %s1569_s8  ;;  %p2509_p11 = scmp.ne.s32.totalorder %s2489_s10, 0 }
  0x51   : > { %1364 = vmatprep.subr.mxu1 %v727_v5  ;;  %1337 = vmatpush3.msra.mxu0 %v248_v4  ;;  %v722_v16 = vld [vmem:[#allocation5 + $0x40] sm:$0xff]  ;;  %v234_v17 = vld [vmem:[%s1799_s13 + $0x8] sm:$0xff]  ;;  %v236_v19 = vld [vmem:[%s1799_s13 + $0x18] sm:$0xff]  ;;  %s1645_s12 = smov [#allocation7]  }
  0x52   : > { %1365 = vmatpush3.msra.mxu1 %v727_v5  ;;  %1338 = vmatprep.subr.mxu0 %v247_v6  ;;  %v237_v20 = vld [vmem:[%s1799_s13 + $0x20] sm:$0xff]  ;;  %v238_v21 = vld [vmem:[%s1799_s13 + $0x28] sm:$0xff]  ;;  %v239_v22 = vld [vmem:[%s1799_s13 + $0x30] sm:$0xff]  ;;  %p1571_p7 = pnand %p1570_p3, %p2509_p11 }
  0x53   : > { %1366 = vmatprep.subr.mxu1 %v726_v7  ;;  %1339 = vmatpush3.msra.mxu0 %v247_v6  ;;  %v240_v23 = vld [vmem:[%s1799_s13 + $0x38] sm:$0xff]  ;;  %s1573_s13 = sshll.u32 %s1645_s12, 4  ;;  %s1574_s13 = int_to_ptr.vmem [resolvable:$false] %s1573_s13 }
  0x54   : > { %1367 = vmatpush3.msra.mxu1 %v726_v7  ;;  %1340 = vmatprep.subr.mxu0 %v246_v8  ;;  %p1572_p9 = pneg %p1571_p7  ;;  %p1576_p10 = scmp.lt.s32.totalorder %s2422_s11, %s1574_s13 }
  0x55   : > { %1368 = vmatprep.subr.mxu1 %v725_v9  ;;  %1341 = vmatpush3.msra.mxu0 %v246_v8 }
  0x56   : > { %1369 = vmatpush3.msra.mxu1 %v725_v9  ;;  %1342 = vmatprep.subr.mxu0 %v245_v10 }
  0x57   : > { %1370 = vmatprep.subr.mxu1 %v724_v11  ;;  %1343 = vmatpush3.msra.mxu0 %v245_v10 }
  0x58   : > { %1371 = vmatpush3.msra.mxu1 %v724_v11  ;;  %1344 = vmatprep.subr.mxu0 %v244_v12 }
  0x59   : > { %1372 = vmatprep.subr.mxu1 %v723_v13  ;;  %1345 = vmatpush3.msra.mxu0 %v244_v12 }
  0x5a   : > { %1348 = vmatprep.mubr.msk.f32.mxu0 %vm251_vm0, %v233_v14  ;;  %1346 = vmatprep.subr.mxu0 %v243_v15 }
  0x5b   : > { %1373 = vmatpush3.msra.mxu1 %v723_v13  ;;  %1347 = vmatpush3.msra.mxu0 %v243_v15 }
  0x5c   : > { %1374 = vmatprep.subr.mxu1 %v722_v16  ;;  %1349 = vmatmul.mubr.msk.f32.vlgmr.msra.gmra.mxu0 %vm251_vm0, %v234_v17 }
  0x5d   : > { %1375 = vmatpush3.msra.mxu1 %v722_v16  ;;  %1376 = vmatprep.mubr.msk.f32.mxu1 %vm251_vm0, %v233_v14 }
  0x5e   : > { %1351 = vmatprep.mubr.msk.f32.mxu0 %vm251_vm0, %v235_v18  ;;  %1377 = vmatmul.mubr.msk.f32.vlgmr.msra.gmra.mxu1 %vm251_vm0, %v234_v17 }
  0x5f   : > { %1379 = vmatprep.mubr.msk.f32.mxu1 %vm251_vm0, %v235_v18 }
  0x60   : > { %1352 = vmatmul.mubr.msk.f32.gmra.mxu0 %vm251_vm0, %v236_v19 }
  0x61   : > { %1354 = vmatprep.mubr.msk.f32.mxu0 %vm251_vm0, %v237_v20 }
  0x62   : > { %1380 = vmatmul.mubr.msk.f32.gmra.mxu1 %vm251_vm0, %v236_v19 }
  0x63   : > { %1382 = vmatprep.mubr.msk.f32.mxu1 %vm251_vm0, %v237_v20 }
  0x64   : > { %1355 = vmatmul.mubr.msk.f32.gmra.mxu0 %vm251_vm0, %v238_v21 }
  0x65   : > { %1357 = vmatprep.mubr.msk.f32.mxu0 %vm251_vm0, %v239_v22 }
  0x66   : > { %1383 = vmatmul.mubr.msk.f32.gmra.mxu1 %vm251_vm0, %v238_v21 }
  0x67   : > { %1385 = vmatprep.mubr.msk.f32.mxu1 %vm251_vm0, %v239_v22 }
  0x68   : > { %1358 = vmatmul.mubr.msk.f32.gmra.mxu0 %vm251_vm0, %v240_v23 }
  0x6a   : > { %1386 = vmatmul.mubr.msk.f32.gmra.mxu1 %vm251_vm0, %v240_v23 }
 0x11c   : > { %v1833_v24 = vpop.f32.mrf.mxu0 }
 0x11d   : > { %525 = vrot.lane.b32.xlu0 %v1833_v24, %s1643_s21  ;;  %v385_v28 = vsel %vm381_vm1, %v1833_v24, 0.0 }
 0x11e   : > { %v1837_v25 = vpop.f32.mrf.mxu0  ;;  %v1839_v26 = vpop.f32.mrf.mxu1 }
 0x11f   : > { %523 = vrot.lane.b32.xlu1 %v1837_v25, %s1643_s21  ;;  %v838_v29 = vsel %vm381_vm1, %v1839_v26, 0.0  ;;  %v382_v31 = vsel %vm381_vm1, %v1837_v25, 0.0 }
 0x120   : > { %v1845_v27 = vpop.f32.mrf.mxu1  ;;  %v1857_v32 = vpop.f32.mrf.mxu0 }
 0x121   : > { %965 = vrot.lane.b32.xlu0 %v1839_v26, %s1643_s21  ;;  %v835_v30 = vsel %vm381_vm1, %v1845_v27, 0.0  ;;  %v391_v35 = vsel %vm381_vm1, %v1857_v32, 0.0 }
 0x122   : > { %v1861_v33 = vpop.f32.mrf.mxu1  ;;  %v1873_v38 = vpop.f32.mrf.mxu0 }
 0x123   : > { %963 = vrot.lane.b32.xlu1 %v1845_v27, %s1643_s21  ;;  %v844_v34 = vsel %vm381_vm1, %v1861_v33, 0.0  ;;  %v388_v41 = vsel %vm381_vm1, %v1873_v38, 0.0 }
 0x124   : > { %v1869_v36 = vpop.f32.mrf.mxu1  ;;  %v1879_v39 = vpop.f32.mrf.mxu0 }
 0x125   : > { %v841_v37 = vsel %vm381_vm1, %v1869_v36, 0.0  ;;  %v397_v43 = vsel %vm381_vm1, %v1879_v39, 0.0 }
 0x126   : > { %v1883_v40 = vpop.f32.mrf.mxu1  ;;  %v1889_v42 = vpop.f32.mrf.mxu0 }
 0x127   : > { %v394_v44 = vsel %vm381_vm1, %v1889_v42, 0.0  ;;  %v850_v52 = vsel %vm381_vm1, %v1883_v40, 0.0 }
 0x128   : > { %v1897_v45 = vpop.f32.mrf.mxu1  ;;  %v1899_v46 = vpop.f32.mrf.mxu0 }
 0x129   : > { %v403_v50 = vsel %vm381_vm1, %v1899_v46, 0.0  ;;  %v847_v11 = vsel %vm381_vm1, %v1897_v45, 0.0 }
 0x12a   : > { %v1905_v47 = vpop.f32.mrf.mxu1  ;;  %v1917_v55 = vpop.f32.mrf.mxu0 }
 0x12b   : > { %v856_v53 = vsel %vm381_vm1, %v1905_v47, 0.0  ;;  %v400_v57 = vsel %vm381_vm1, %v1917_v55, 0.0 }
 0x12c   : > { %v1927_v0 = vpop.f32.mrf.mxu1 }
 0x12d   : > { %v853_v13 = vsel %vm381_vm1, %v1927_v0, 0.0 }
 0x140   : > { %386 = vadd.xlane.f32.xlu0 %v385_v28 }
 0x144   : > { %839 = vadd.xlane.f32.xlu0 %v838_v29 }
 0x147   : > { %836 = vadd.xlane.f32.xlu1 %v835_v30 }
 0x148   : > { %383 = vadd.xlane.f32.xlu0 %v382_v31 }
 0x158   : > { %529 = vrot.lane.b32.xlu1 %v1857_v32, %s1643_s21 }
 0x15e   : > { %969 = vrot.lane.b32.xlu0 %v1861_v33, %s1643_s21 }
 0x17c   : > { %392 = vadd.xlane.f32.xlu1 %v391_v35 }
 0x17d   : > { %845 = vadd.xlane.f32.xlu0 %v844_v34 }
 0x181   : > { %842 = vadd.xlane.f32.xlu0 %v841_v37 }
 0x18d   : > { %527 = vrot.lane.b32.xlu1 %v1873_v38, %s1643_s21 }
 0x18f   : > { %v526_v48 = vpop.permute.xlu0 %525 }
 0x190   : > { %v550_v60 = vsel %vm381_vm1, %v526_v48, 0.0 }
 0x191   : > { %967 = vrot.lane.b32.xlu1 %v1869_v36, %s1643_s21  ;;  %v524_v54 = vpop.permute.xlu1 %523 }
 0x192   : > { %v547_v2 = vsel %vm381_vm1, %v524_v54, 0.0 }
 0x193   : > { %v966_v49 = vpop.permute.xlu0 %965 }
 0x194   : > { %v990_v63 = vsel %vm381_vm1, %v966_v49, 0.0 }
 0x195   : > { %v964_v58 = vpop.permute.xlu1 %963 }
 0x196   : > { %v987_v15 = vsel %vm381_vm1, %v964_v58, 0.0 }
 0x197   : > { %533 = vrot.lane.b32.xlu0 %v1879_v39, %s1643_s21 }
 0x19b   : > { %973 = vrot.lane.b32.xlu0 %v1883_v40, %s1643_s21 }
 0x1b5   : > { %389 = vadd.xlane.f32.xlu1 %v388_v41 }
 0x1b9   : > { %398 = vadd.xlane.f32.xlu1 %v397_v43 }
 0x1ba   : > { %395 = vadd.xlane.f32.xlu0 %v394_v44 }
 0x1c9   : > { %v1911_v51 = vpop.xlane.xlu0 %386 }
 0x1ca   : > { %531 = vrot.lane.b32.xlu1 %v1889_v42, %s1643_s21 }
 0x1cd   : > { %v1919_v56 = vpop.xlane.xlu0 %839 }
 0x1ce   : > { %971 = vrot.lane.b32.xlu1 %v1897_v45, %s1643_s21 }
 0x1d0   : > { %537 = vrot.lane.b32.xlu0 %v1899_v46, %s1643_s21  ;;  %v837_v61 = vpop.xlane.xlu1 %836 }
 0x1d1   : > { %v384_v59 = vpop.xlane.xlu0 %383  ;;  %v859_v30 = vmul.f32 0.03125, %v837_v61 }
 0x1d2   : > { %v407_v22 = vmul.f32 0.03125, %v384_v59 }
 0x1d3   : > { %v1954_v43 = vsub.f32 %v1845_v27, %v859_v30 }
 0x1d4   : > { %977 = vrot.lane.b32.xlu0 %v1905_v47, %s1643_s21  ;;  %v530_v3 = vpop.permute.xlu1 %529  ;;  %v1949_v31 = vsub.f32 %v1837_v25, %v407_v22 }
 0x1d5   : > { %v970_v62 = vpop.permute.xlu0 %969  ;;  %v556_v5 = vsel %vm381_vm1, %v530_v3, 0.0  ;;  %v875_v54 = vmul.f32 %v1954_v43, %v1954_v43 }
 0x1d6   : > { %v996_v6 = vsel %vm381_vm1, %v970_v62, 0.0  ;;  %v423_v49 = vmul.f32 %v1949_v31, %v1949_v31 }
 0x1d7   : > { %v883_v58 = vsel %vm381_vm1, %v875_v54, 0.0 }
 0x1f2   : > { %404 = vadd.xlane.f32.xlu1 %v403_v50 }
 0x1f3   : > { %851 = vadd.xlane.f32.xlu0 %v850_v52 }
 0x1f7   : > { %857 = vadd.xlane.f32.xlu0 %v856_v53  ;;  %v431_v53 = vsel %vm381_vm1, %v423_v49, 0.0 }
 0x1fb   : > { %401 = vadd.xlane.f32.xlu0 %v400_v57 }
 0x1ff   : > { %551 = vadd.xlane.f32.xlu0 %v550_v60 }
 0x203   : > { %535 = vrot.lane.b32.xlu1 %v1917_v55, %s1643_s21  ;;  %991 = vadd.xlane.f32.xlu0 %v990_v63 }
 0x205   : > { %v393_v12 = vpop.xlane.xlu1 %392 }
 0x206   : > { %v1929_v1 = vpop.xlane.xlu0 %845 }
 0x207   : > { %975 = vrot.lane.b32.xlu1 %v1927_v0, %s1643_s21  ;;  %548 = vadd.xlane.f32.xlu0 %v547_v2  ;;  %v408_v2 = vmul.f32 0.03125, %v1911_v51 }
 0x209   : > { %v528_v14 = vpop.permute.xlu1 %527 }
 0x20a   : > { %v1934_v4 = vpop.xlane.xlu0 %842  ;;  %v553_v16 = vsel %vm381_vm1, %v528_v14, 0.0 }
 0x20b   : > { %557 = vadd.xlane.f32.xlu0 %v556_v5 }
 0x20d   : > { %v968_v17 = vpop.permute.xlu1 %967 }
 0x20e   : > { %v534_v7 = vpop.permute.xlu0 %533  ;;  %v993_v18 = vsel %vm381_vm1, %v968_v17, 0.0 }
 0x20f   : > { %997 = vadd.xlane.f32.xlu0 %v996_v6  ;;  %v562_v8 = vsel %vm381_vm1, %v534_v7, 0.0  ;;  %v1979_v6 = vsub.f32 %v1833_v24, %v408_v2  ;;  %v410_v7 = vmul.f32 0.03125, %v393_v12 }
 0x212   : > { %v974_v9 = vpop.permute.xlu0 %973 }
 0x213   : > { %563 = vadd.xlane.f32.xlu0 %v562_v8  ;;  %v1002_v10 = vsel %vm381_vm1, %v974_v9, 0.0 }
 0x217   : > { %1003 = vadd.xlane.f32.xlu0 %v1002_v10 }
 0x22b   : > { %848 = vadd.xlane.f32.xlu1 %v847_v11  ;;  %v1985_v11 = vsub.f32 %v1857_v32, %v410_v7 }
 0x22f   : > { %854 = vadd.xlane.f32.xlu1 %v853_v13 }
 0x233   : > { %988 = vadd.xlane.f32.xlu1 %v987_v15  ;;  %v424_v15 = vmul.f32 %v1979_v6, %v1979_v6 }
 0x237   : > { %554 = vadd.xlane.f32.xlu1 %v553_v16 }
 0x23b   : > { %994 = vadd.xlane.f32.xlu1 %v993_v18 }
 0x23e   : > { %v390_v19 = vpop.xlane.xlu1 %389 }
 0x23f   : > { %v409_v44 = vmul.f32 0.03125, %v390_v19  ;;  %v434_v19 = vsel %vm381_vm1, %v424_v15, 0.0 }
 0x241   : > { %v1960_v50 = vsub.f32 %v1873_v38, %v409_v44 }
 0x242   : > { %v399_v20 = vpop.xlane.xlu1 %398 }
 0x243   : > { %v396_v21 = vpop.xlane.xlu0 %395  ;;  %v425_v59 = vmul.f32 %v1960_v50, %v1960_v50  ;;  %v412_v13 = vmul.f32 0.03125, %v399_v20  ;;  %v426_v20 = vmul.f32 %v1985_v11, %v1985_v11 }
 0x244   : > { %v411_v52 = vmul.f32 0.03125, %v396_v21 }
 0x245   : > { %v437_v60 = vsel %vm381_vm1, %v425_v59, 0.0  ;;  %v1994_v17 = vsub.f32 %v1879_v39, %v412_v13 }
 0x246   : > { %v532_v23 = vpop.permute.xlu1 %531  ;;  %v1966_v57 = vsub.f32 %v1889_v42, %v411_v52 }
 0x247   : > { %v538_v28 = vpop.permute.xlu0 %537  ;;  %v559_v29 = vsel %vm381_vm1, %v532_v23, 0.0  ;;  %v428_v30 = vmul.f32 %v1994_v17, %v1994_v17 }
 0x248   : > { %560 = vadd.xlane.f32.xlu1 %v559_v29  ;;  %v568_v34 = vsel %vm381_vm1, %v538_v28, 0.0  ;;  %v427_v61 = vmul.f32 %v1966_v57, %v1966_v57  ;;  %v440_v29 = vsel %vm381_vm1, %v426_v20, 0.0 }
 0x249   : > { %569 = vadd.xlane.f32.xlu0 %v568_v34 }
 0x24a   : > { %v972_v35 = vpop.permute.xlu1 %971  ;;  %v443_v62 = vsel %vm381_vm1, %v427_v61, 0.0 }
 0x24b   : > { %v978_v37 = vpop.permute.xlu0 %977  ;;  %v999_v41 = vsel %vm381_vm1, %v972_v35, 0.0  ;;  %v446_v35 = vsel %vm381_vm1, %v428_v30, 0.0 }
 0x24c   : > { %1000 = vadd.xlane.f32.xlu1 %v999_v41  ;;  %v1008_v48 = vsel %vm381_vm1, %v978_v37, 0.0 }
 0x24d   : > { %1009 = vadd.xlane.f32.xlu0 %v1008_v48 }
 0x251   : > { %432 = vadd.xlane.f32.xlu0 %v431_v53 }
 0x255   : > { %884 = vadd.xlane.f32.xlu0 %v883_v58 }
 0x259   : > { %438 = vadd.xlane.f32.xlu0 %v437_v60 }
 0x25d   : > { %444 = vadd.xlane.f32.xlu0 %v443_v62 }
 0x27b   : > { %v405_v63 = vpop.xlane.xlu1 %404 }
 0x27c   : > { %v1976_v3 = vpop.xlane.xlu0 %851  ;;  %v414_v18 = vmul.f32 0.03125, %v405_v63 }
 0x27e   : > { %v2003_v28 = vsub.f32 %v1899_v46, %v414_v18 }
 0x27f   : > { %v536_v5 = vpop.permute.xlu1 %535 }
 0x280   : > { %v1981_v8 = vpop.xlane.xlu0 %857  ;;  %v565_v9 = vsel %vm381_vm1, %v536_v5, 0.0  ;;  %v430_v37 = vmul.f32 %v2003_v28, %v2003_v28 }
 0x281   : > { %566 = vadd.xlane.f32.xlu1 %v565_v9 }
 0x282   : > { %v452_v41 = vsel %vm381_vm1, %v430_v37, 0.0 }
 0x283   : > { %v976_v10 = vpop.permute.xlu1 %975 }
 0x284   : > { %v402_v14 = vpop.xlane.xlu0 %401  ;;  %v1005_v51 = vsel %vm381_vm1, %v976_v10, 0.0 }
 0x285   : > { %v413_v16 = vmul.f32 0.03125, %v402_v14  ;;  %1006 = vadd.xlane.f32.xlu1 %v1005_v51 }
 0x287   : > { %v1991_v12 = vsub.f32 %v1917_v55, %v413_v16 }
 0x288   : > { %v552_v21 = vpop.xlane.xlu0 %551 }
 0x289   : > { %435 = vadd.xlane.f32.xlu1 %v434_v19  ;;  %v429_v22 = vmul.f32 %v1991_v12, %v1991_v12  ;;  %v572_v49 = vmul.f32 0.03125, %v552_v21 }
 0x28b   : > { %v449_v23 = vsel %vm381_vm1, %v429_v22, 0.0  ;;  %v2016_v53 = vsub.f32 %v1833_v24, %v572_v49 }
 0x28c   : > { %450 = vadd.xlane.f32.xlu0 %v449_v23  ;;  %v992_v34 = vpop.xlane.xlu0 %991 }
 0x28d   : > { %441 = vadd.xlane.f32.xlu1 %v440_v29  ;;  %v1012_v54 = vmul.f32 0.03125, %v992_v34  ;;  %v588_v60 = vmul.f32 %v2016_v53, %v2016_v53 }
 0x28f   : > { %v2022_v59 = vsub.f32 %v1839_v26, %v1012_v54 }
 0x290   : > { %v549_v44 = vpop.xlane.xlu0 %548 }
 0x291   : > { %447 = vadd.xlane.f32.xlu1 %v446_v35  ;;  %v571_v48 = vmul.f32 0.03125, %v549_v44 }
 0x293   : > { %v2013_v52 = vsub.f32 %v1837_v25, %v571_v48  ;;  %v1028_v25 = vmul.f32 %v2022_v59, %v2022_v59 }
 0x294   : > { %v558_v61 = vpop.xlane.xlu0 %557 }
 0x295   : > { %453 = vadd.xlane.f32.xlu1 %v452_v41  ;;  %v587_v58 = vmul.f32 %v2013_v52, %v2013_v52  ;;  %v574_v2 = vmul.f32 0.03125, %v558_v61 }
 0x297   : > { %v2038_v13 = vsub.f32 %v1857_v32, %v574_v2 }
 0x298   : > { %v998_v7 = vpop.xlane.xlu0 %997 }
 0x299   : > { %v1014_v14 = vmul.f32 0.03125, %v998_v7 }
 0x29b   : > { %v2044_v18 = vsub.f32 %v1861_v33, %v1014_v14 }
 0x29c   : > { %v564_v15 = vpop.xlane.xlu0 %563 }
 0x29d   : > { %v576_v32 = vmul.f32 0.03125, %v564_v15  ;;  %v1030_v29 = vmul.f32 %v2044_v18, %v2044_v18 }
 0x29f   : > { %v2062_v34 = vsub.f32 %v1879_v39, %v576_v32 }
 0x2a0   : > { %v1004_v30 = vpop.xlane.xlu0 %1003 }
 0x2a1   : > { %v1016_v35 = vmul.f32 0.03125, %v1004_v30  ;;  %v592_v44 = vmul.f32 %v2062_v34, %v2062_v34 }
 0x2a2   : > { %603 = vrot.lane.b32.xlu0 %v587_v58, %s1643_s21 }
 0x2a6   : > { %605 = vrot.lane.b32.xlu1 %v588_v60, %s1643_s21 }
 0x2aa   : > { %1045 = vrot.lane.b32.xlu1 %v1028_v25, %s1643_s21 }
 0x2b4   : > { %v2030_v24 = vpop.xlane.xlu1 %848 }
 0x2b8   : > { %v2032_v62 = vpop.xlane.xlu1 %854 }
 0x2bc   : > { %v989_v63 = vpop.xlane.xlu1 %988 }
 0x2bd   : > { %v1011_v5 = vmul.f32 0.03125, %v989_v63 }
 0x2bf   : > { %v2035_v9 = vsub.f32 %v1845_v27, %v1011_v5  ;;  %v590_v27 = vmul.f32 %v2038_v13, %v2038_v13 }
 0x2c0   : > { %v555_v10 = vpop.xlane.xlu1 %554 }
 0x2c1   : > { %v1027_v51 = vmul.f32 %v2035_v9, %v2035_v9  ;;  %v573_v19 = vmul.f32 0.03125, %v555_v10 }
 0x2c3   : > { %1043 = vrot.lane.b32.xlu1 %v1027_v51, %s1643_s21  ;;  %v2053_v22 = vsub.f32 %v1873_v38, %v573_v19  ;;  %v2068_v38 = vsub.f32 %v1883_v40, %v1016_v35  ;;  %v861_v51 = vmul.f32 0.03125, %v1934_v4  ;;  %v864_v4 = vmul.f32 0.03125, %v1976_v3 }
 0x2c4   : > { %v995_v16 = vpop.xlane.xlu1 %994 }
 0x2c5   : > { %v1013_v20 = vmul.f32 0.03125, %v995_v16  ;;  %v589_v37 = vmul.f32 %v2053_v22, %v2053_v22  ;;  %v1032_v25 = vmul.f32 %v2068_v38, %v2068_v38  ;;  %v2102_v15 = vsub.f32 %v1869_v36, %v861_v51 }
 0x2c6   : > { %v860_v16 = vmul.f32 0.03125, %v1919_v56  ;;  %v2119_v56 = vsub.f32 %v1883_v40, %v864_v4  ;;  %v863_v51 = vmul.f32 0.03125, %v2030_v24 }
 0x2c7   : > { %v2049_v21 = vsub.f32 %v1869_v36, %v1013_v20  ;;  %609 = vrot.lane.b32.xlu1 %v590_v27, %s1643_s21  ;;  %v877_v19 = vmul.f32 %v2102_v15, %v2102_v15  ;;  %v862_v27 = vmul.f32 0.03125, %v1929_v1 }
 0x2c8   : > { %v2108_v20 = vsub.f32 %v1839_v26, %v860_v16  ;;  %v880_v3 = vmul.f32 %v2119_v56, %v2119_v56 }
 0x2c9   : > { %v1029_v23 = vmul.f32 %v2049_v21, %v2049_v21  ;;  %v889_v32 = vsel %vm381_vm1, %v877_v19, 0.0 }
 0x2ca   : > { %v876_v36 = vmul.f32 %v2108_v20, %v2108_v20  ;;  %v898_v40 = vsel %vm381_vm1, %v880_v3, 0.0 }
 0x2cb   : > { %1047 = vrot.lane.b32.xlu0 %v1029_v23, %s1643_s21  ;;  %1049 = vrot.lane.b32.xlu1 %v1030_v29, %s1643_s21  ;;  %v2113_v23 = vsub.f32 %v1861_v33, %v862_v27  ;;  %v866_v29 = vmul.f32 0.03125, %v1981_v8  ;;  %v2165_v27 = vsub.f32 %v1897_v45, %v863_v51 }
 0x2cc   : > { %v886_v26 = vsel %vm381_vm1, %v876_v36, 0.0 }
 0x2cd   : > { %v878_v1 = vmul.f32 %v2113_v23, %v2113_v23  ;;  %v2126_v30 = vsub.f32 %v1905_v47, %v866_v29  ;;  %v879_v29 = vmul.f32 %v2165_v27, %v2165_v27 }
 0x2cf   : > { %607 = vrot.lane.b32.xlu1 %v589_v37, %s1643_s21  ;;  %v892_v33 = vsel %vm381_vm1, %v878_v1, 0.0  ;;  %v882_v8 = vmul.f32 %v2126_v30, %v2126_v30  ;;  %v895_v24 = vsel %vm381_vm1, %v879_v29, 0.0 }
 0x2d1   : > { %v561_v41 = vpop.xlane.xlu1 %560 }
 0x2d2   : > { %v575_v48 = vmul.f32 0.03125, %v561_v41  ;;  %v570_v49 = vpop.xlane.xlu0 %569 }
 0x2d3   : > { %v578_v54 = vmul.f32 0.03125, %v570_v49  ;;  %613 = vrot.lane.b32.xlu1 %v592_v44, %s1643_s21 }
 0x2d4   : > { %v2074_v39 = vsub.f32 %v1889_v42, %v575_v48 }
 0x2d5   : > { %v2077_v58 = vsub.f32 %v1899_v46, %v578_v54  ;;  %v1001_v60 = vpop.xlane.xlu1 %1000 }
 0x2d6   : > { %2495 = vst [vmem:[#allocation11_spill] sm:$0xff] %v2074_v39  ;;  %v1015_v61 = vmul.f32 0.03125, %v1001_v60  ;;  %v1010_v63 = vpop.xlane.xlu0 %1009  ;;  %v591_v2 = vmul.f32 %v2074_v39, %v2074_v39 }
 0x2d7   : > { %2496 = vst [vmem:[#allocation12_spill] sm:$0xff] %v2077_v58  ;;  %v1018_v5 = vmul.f32 0.03125, %v1010_v63  ;;  %1053 = vrot.lane.b32.xlu1 %v1032_v25, %s1643_s21  ;;  %v594_v46 = vmul.f32 %v2077_v58, %v2077_v58 }
 0x2d8   : > { %v2085_v7 = vsub.f32 %v1897_v45, %v1015_v61  ;;  %611 = vrot.lane.b32.xlu0 %v591_v2, %s1643_s21 }
 0x2d9   : > { %v2089_v42 = vsub.f32 %v1905_v47, %v1018_v5  ;;  %v904_v47 = vsel %vm381_vm1, %v882_v8, 0.0 }
 0x2da   : > { %2497 = vst [vmem:[#allocation13_spill] sm:$0xff] %v2085_v7  ;;  %v1031_v10 = vmul.f32 %v2085_v7, %v2085_v7  ;;  %v2153_v63 = vpop.xlane.xlu0 %432 }
 0x2db   : > { %2498 = vst [vmem:[#allocation14_spill] sm:$0xff] %v2089_v42  ;;  %617 = vrot.lane.b32.xlu1 %v594_v46, %s1643_s21  ;;  %v1034_v14 = vmul.f32 %v2089_v42, %v2089_v42 }
 0x2dc   : > { %1051 = vrot.lane.b32.xlu0 %v1031_v10, %s1643_s21 }
 0x2de   : > { %v2157_v5 = vpop.xlane.xlu0 %884 }
 0x2df   : > { %1057 = vrot.lane.b32.xlu1 %v1034_v14, %s1643_s21 }
 0x2e2   : > { %v2162_v19 = vpop.xlane.xlu0 %438 }
 0x2e6   : > { %v2168_v4 = vpop.xlane.xlu0 %444 }
 0x2fb   : > { %890 = vadd.xlane.f32.xlu0 %v889_v32  ;;  %v865_v32 = vmul.f32 0.03125, %v2032_v62 }
 0x2fd   : > { %v2171_v36 = vsub.f32 %v1927_v0, %v865_v32 }
 0x2ff   : > { %2501 = vst [vmem:[#allocation17_spill] sm:$0xff] %v2171_v36  ;;  %v881_v1 = vmul.f32 %v2171_v36, %v2171_v36 }
 0x303   : > { %887 = vadd.xlane.f32.xlu1 %v886_v26 }
 0x307   : > { %893 = vadd.xlane.f32.xlu1 %v892_v33  ;;  %v901_v33 = vsel %vm381_vm1, %v881_v1, 0.0 }
 0x30a   : > { %v567_v35 = vpop.xlane.xlu1 %566 }
 0x30b   : > { %v577_v37 = vmul.f32 0.03125, %v567_v35  ;;  %899 = vadd.xlane.f32.xlu1 %v898_v40 }
 0x30d   : > { %v2135_v41 = vsub.f32 %v1917_v55, %v577_v37 }
 0x30e   : > { %v1007_v44 = vpop.xlane.xlu1 %1006 }
 0x30f   : > { %2499 = vst [vmem:[#allocation15_spill] sm:$0xff] %v2135_v41  ;;  %v1017_v48 = vmul.f32 0.03125, %v1007_v44  ;;  %905 = vadd.xlane.f32.xlu1 %v904_v47  ;;  %v593_v49 = vmul.f32 %v2135_v41, %v2135_v41 }
 0x311   : > { %v2141_v54 = vsub.f32 %v1927_v0, %v1017_v48  ;;  %615 = vrot.lane.b32.xlu0 %v593_v49, %s1643_s21 }
 0x312   : > { %v2144_v60 = vpop.xlane.xlu1 %435 }
 0x313   : > { %2500 = vst [vmem:[#allocation16_spill] sm:$0xff] %v2141_v54  ;;  %v1033_v25 = vmul.f32 %v2141_v54, %v2141_v54 }
 0x315   : > { %1055 = vrot.lane.b32.xlu0 %v1033_v25, %s1643_s21  ;;  %v2175_v26 = vpop.xlane.xlu0 %450  ;;  %s1575_s21 = scalar_lea.vmem %s1574_s13, 4096 }
 0x316   : > { %v2149_v55 = vpop.xlane.xlu1 %441  ;;  %p1577_p12 = scmp.lt.s32.totalorder %s1575_s21, %s1569_s8 }
 0x317   : > { %v458_v41 = vmul.f32 0.03125, %v2149_v55 }
 0x318   : > { %p1578_p13 = por %p1577_p12, %p1576_p10 }
 0x319   : > { %v604_v62 = vpop.permute.xlu0 %603 }
 0x31a   : > { %v2151_v61 = vpop.xlane.xlu1 %447  ;;  %v627_v0 = vsel %vm381_vm1, %v604_v62, 0.0  ;;  %v2196_v62 = vld [vmem:[%s2471_s3] ss:$0 sm:$0xff]  ;;  %p1579_p0 = pnand %p1578_p13, %p1572_p9 }
 0x31e   : > { %v2155_v2 = vpop.xlane.xlu1 %453 }
 0x322   : > { %v606_v46 = vpop.permute.xlu1 %605 }
 0x323   : > { %v630_v10 = vsel %vm381_vm1, %v606_v46, 0.0 }
 0x324   : > { %631 = vadd.xlane.f32.xlu1 %v630_v10 }
 0x326   : > { %v1046_v14 = vpop.permute.xlu1 %1045 }
 0x327   : > { %v1070_v16 = vsel %vm381_vm1, %v1046_v14, 0.0 }
 0x328   : > { %1071 = vadd.xlane.f32.xlu1 %v1070_v16 }
 0x334   : > { %896 = vadd.xlane.f32.xlu0 %v895_v24 }
 0x335   : > { %v1044_v45 = vpop.permute.xlu1 %1043 }
 0x336   : > { %v1067_v8 = vsel %vm381_vm1, %v1044_v45, 0.0 }
 0x338   : > { %902 = vadd.xlane.f32.xlu0 %v901_v33 }
 0x339   : > { %v610_v3 = vpop.permute.xlu1 %609 }
 0x33a   : > { %v636_v44 = vsel %vm381_vm1, %v610_v3, 0.0 }
 0x33c   : > { %628 = vadd.xlane.f32.xlu0 %v627_v0 }
 0x33d   : > { %v1050_v35 = vpop.permute.xlu1 %1049  ;;  %v1048_v48 = vpop.permute.xlu0 %1047 }
 0x33e   : > { %v1076_v40 = vsel %vm381_vm1, %v1050_v35, 0.0  ;;  %v1073_v51 = vsel %vm381_vm1, %v1048_v48, 0.0 }
 0x33f   : > { %1077 = vadd.xlane.f32.xlu1 %v1076_v40 }
 0x340   : > { %1068 = vadd.xlane.f32.xlu0 %v1067_v8 }
 0x341   : > { %v608_v37 = vpop.permute.xlu1 %607 }
 0x342   : > { %v633_v25 = vsel %vm381_vm1, %v608_v37, 0.0  ;;  %v2204_v37 = vld [vmem:[%s2470_s2] ss:$0 sm:$0xff] }
 0x344   : > { %637 = vadd.xlane.f32.xlu0 %v636_v44 }
 0x345   : > { %v614_v47 = vpop.permute.xlu1 %613 }
 0x346   : > { %v642_v49 = vsel %vm381_vm1, %v614_v47, 0.0 }
 0x347   : > { %643 = vadd.xlane.f32.xlu1 %v642_v49 }
 0x348   : > { %634 = vadd.xlane.f32.xlu0 %v633_v25 }
 0x349   : > { %v1054_v46 = vpop.permute.xlu1 %1053 }
 0x34a   : > { %v612_v10 = vpop.permute.xlu0 %611  ;;  %v1082_v14 = vsel %vm381_vm1, %v1054_v46, 0.0 }
 0x34b   : > { %1083 = vadd.xlane.f32.xlu1 %v1082_v14  ;;  %v639_v29 = vsel %vm381_vm1, %v612_v10, 0.0 }
 0x34c   : > { %1074 = vadd.xlane.f32.xlu0 %v1073_v51 }
 0x34d   : > { %v618_v16 = vpop.permute.xlu1 %617 }
 0x34e   : > { %v648_v32 = vsel %vm381_vm1, %v618_v16, 0.0  ;;  %v1052_v24 = vpop.permute.xlu0 %1051 }
 0x34f   : > { %649 = vadd.xlane.f32.xlu1 %v648_v32  ;;  %v1079_v33 = vsel %vm381_vm1, %v1052_v24, 0.0  ;;  %v455_v32 = vmul.f32 0.03125, %v2153_v63  ;;  %v460_v63 = vmul.f32 0.03125, %v2151_v61 }
 0x350   : > { %640 = vadd.xlane.f32.xlu0 %v639_v29  ;;  %v907_v29 = vmul.f32 0.03125, %v2157_v5 }
 0x351   : > { %v1058_v1 = vpop.permute.xlu1 %1057 }
 0x352   : > { %v1088_v45 = vsel %vm381_vm1, %v1058_v1, 0.0  ;;  %v457_v1 = vmul.f32 0.03125, %v2162_v19  ;;  %v462_v19 = vmul.f32 0.03125, %v2155_v2 }
 0x353   : > { %1089 = vadd.xlane.f32.xlu1 %v1088_v45 }
 0x354   : > { %1080 = vadd.xlane.f32.xlu0 %v1079_v33  ;;  %v459_v33 = vmul.f32 0.03125, %v2168_v4  ;;  %v465_v54 = vadd.f32 1e-05, %v457_v1  ;;  %v470_v55 = vadd.f32 1e-05, %v462_v19 }
 0x356   : > { %v467_v7 = vadd.f32 1e-05, %v459_v33 }
 0x364   : > { %694 = vrot.lane.b32.xlu1 %v2196_v62, %s1644_s6 }
 0x384   : > { %v891_v3 = vpop.xlane.xlu0 %890 }
 0x388   : > { %v616_v0 = vpop.permute.xlu0 %615 }
 0x389   : > { %v645_v35 = vsel %vm381_vm1, %v616_v0, 0.0  ;;  %v463_v0 = vadd.f32 1e-05, %v455_v32  ;;  %v909_v32 = vmul.f32 0.03125, %v891_v3 }
 0x38a   : > { %646 = vadd.xlane.f32.xlu0 %v645_v35  ;;  %v456_v35 = vmul.f32 0.03125, %v2144_v60  ;;  %v466_v60 = vadd.f32 1e-05, %v458_v41 }
 0x38b   : > { %1451 = vrsqrt.f32 %v463_v0  ;;  %v917_v61 = vadd.f32 1e-05, %v909_v32 }
 0x38c   : > { %v1056_v40 = vpop.permute.xlu0 %1055  ;;  %v888_v44 = vpop.xlane.xlu1 %887  ;;  %v464_v42 = vadd.f32 1e-05, %v456_v35 }
 0x38d   : > { %v1085_v8 = vsel %vm381_vm1, %v1056_v40, 0.0  ;;  %v915_v40 = vadd.f32 1e-05, %v907_v29  ;;  %v908_v29 = vmul.f32 0.03125, %v888_v44 }
 0x38e   : > { %1086 = vadd.xlane.f32.xlu0 %v1085_v8  ;;  %v461_v8 = vmul.f32 0.03125, %v2175_v26  ;;  %v468_v26 = vadd.f32 1e-05, %v460_v63 }
 0x38f   : > { %1453 = vrsqrt.f32 %v915_v40  ;;  %v916_v35 = vadd.f32 1e-05, %v908_v29 }
 0x390   : > { %v894_v47 = vpop.xlane.xlu1 %893  ;;  %v469_v4 = vadd.f32 1e-05, %v461_v8  ;;  %1455 = vrsqrt.f32 %v465_v54 }
 0x391   : > { %1457 = vrsqrt.f32 %v467_v7  ;;  %v910_v1 = vmul.f32 0.03125, %v894_v47 }
 0x392   : > { %1459 = vrsqrt.f32 %v464_v42 }
 0x393   : > { %1461 = vrsqrt.f32 %v469_v4  ;;  %v918_v40 = vadd.f32 1e-05, %v910_v1 }
 0x394   : > { %v900_v49 = vpop.xlane.xlu1 %899  ;;  %1463 = vrsqrt.f32 %v466_v60 }
 0x395   : > { %v912_v39 = vmul.f32 0.03125, %v900_v49  ;;  %1465 = vrsqrt.f32 %v468_v26 }
 0x396   : > { %1467 = vrsqrt.f32 %v470_v55 }
 0x397   : > { %v920_v41 = vadd.f32 1e-05, %v912_v39  ;;  %1469 = vrsqrt.f32 %v917_v61 }
 0x398   : > { %v906_v46 = vpop.xlane.xlu1 %905  ;;  %1471 = vrsqrt.f32 %v916_v35  ;;  %v1452_v4 = vpop.eup %1451 }
 0x399   : > { %v914_v58 = vmul.f32 0.03125, %v906_v46  ;;  %1473 = vrsqrt.f32 %v918_v40 }
 0x39a   : > { %1475 = vrsqrt.f32 %v920_v41 }
 0x39b   : > { %v922_v7 = vadd.f32 1e-05, %v914_v58 }
 0x39c   : > { %v1454_v39 = vpop.eup %1453 }
 0x39d   : > { %1477 = vrsqrt.f32 %v922_v7 }
 0x3a4   : > { %683 = vrot.lane.b32.xlu0 %v2204_v37, %s1644_s6 }
 0x3ad   : > { %v632_v14 = vpop.xlane.xlu1 %631 }
 0x3ae   : > { %v652_v2 = vmul.f32 0.03125, %v632_v14 }
 0x3b0   : > { %v660_v42 = vadd.f32 1e-05, %v652_v2 }
 0x3b1   : > { %v1072_v16 = vpop.xlane.xlu1 %1071 }
 0x3b2   : > { %v1092_v3 = vmul.f32 0.03125, %v1072_v16  ;;  %1479 = vrsqrt.f32 %v660_v42 }
 0x3b4   : > { %v1100_v8 = vadd.f32 1e-05, %v1092_v3 }
 0x3b6   : > { %1481 = vrsqrt.f32 %v1100_v8 }
 0x3bd   : > { %v897_v48 = vpop.xlane.xlu0 %896 }
 0x3be   : > { %v911_v54 = vmul.f32 0.03125, %v897_v48 }
 0x3c0   : > { %v919_v19 = vadd.f32 1e-05, %v911_v54 }
 0x3c1   : > { %v2207_v25 = vpop.xlane.xlu0 %902 }
 0x3c2   : > { %1483 = vrsqrt.f32 %v919_v19 }
 0x3c5   : > { %v629_v10 = vpop.xlane.xlu0 %628 }
 0x3c6   : > { %v651_v44 = vmul.f32 0.03125, %v629_v10  ;;  %v1456_v10 = vpop.eup %1455 }
 0x3c7   : > { %v1458_v29 = vpop.eup %1457 }
 0x3c8   : > { %v1078_v45 = vpop.xlane.xlu1 %1077  ;;  %v659_v16 = vadd.f32 1e-05, %v651_v44  ;;  %v1460_v55 = vpop.eup %1459 }
 0x3c9   : > { %v1069_v51 = vpop.xlane.xlu0 %1068  ;;  %v1094_v47 = vmul.f32 0.03125, %v1078_v45  ;;  %v1462_v2 = vpop.eup %1461 }
 0x3ca   : > { %v1091_v46 = vmul.f32 0.03125, %v1069_v51  ;;  %1485 = vrsqrt.f32 %v659_v16  ;;  %v1464_v3 = vpop.eup %1463 }
 0x3cb   : > { %v1102_v48 = vadd.f32 1e-05, %v1094_v47  ;;  %v1466_v54 = vpop.eup %1465 }
 0x3cc   : > { %v1099_v60 = vadd.f32 1e-05, %v1091_v46  ;;  %v1468_v44 = vpop.eup %1467 }
 0x3cd   : > { %v638_v24 = vpop.xlane.xlu0 %637  ;;  %1487 = vrsqrt.f32 %v1102_v48  ;;  %v1470_v42 = vpop.eup %1469  ;;  %v931_v48 = vmul.f32 %v1454_v39, %v1954_v43  ;;  %v913_v43 = vmul.f32 0.03125, %v2207_v25 }
 0x3ce   : > { %v654_v14 = vmul.f32 0.03125, %v638_v24  ;;  %1489 = vrsqrt.f32 %v1099_v60  ;;  %v481_v60 = vmul.f32 %v1456_v10, %v1960_v50 }
 0x3cf   : > { %v939_v50 = vmul.f32 %v2204_v37, %v931_v48 }
 0x3d0   : > { %v644_v36 = vpop.xlane.xlu1 %643  ;;  %v662_v26 = vadd.f32 1e-05, %v654_v14  ;;  %v479_v14 = vmul.f32 %v1452_v4, %v1949_v31  ;;  %v482_v4 = vmul.f32 %v1464_v3, %v1985_v11 }
 0x3d1   : > { %v635_v5 = vpop.xlane.xlu0 %634  ;;  %v656_v32 = vmul.f32 0.03125, %v644_v36 }
 0x3d2   : > { %v653_v58 = vmul.f32 0.03125, %v635_v5  ;;  %1491 = vrsqrt.f32 %v662_v26 }
 0x3d3   : > { %v664_v24 = vadd.f32 1e-05, %v656_v32 }
 0x3d4   : > { %v1084_v33 = vpop.xlane.xlu1 %1083  ;;  %v661_v36 = vadd.f32 1e-05, %v653_v58 }
 0x3d5   : > { %v1075_v0 = vpop.xlane.xlu0 %1074  ;;  %v1096_v45 = vmul.f32 0.03125, %v1084_v33  ;;  %1493 = vrsqrt.f32 %v664_v24  ;;  %v484_v24 = vmul.f32 %v1466_v54, %v1994_v17 }
 0x3d6   : > { %v1093_v51 = vmul.f32 0.03125, %v1075_v0  ;;  %1495 = vrsqrt.f32 %v661_v36 }
 0x3d7   : > { %v1104_v5 = vadd.f32 1e-05, %v1096_v45  ;;  %v483_v45 = vmul.f32 %v1458_v29, %v1966_v57  ;;  %v933_v57 = vmul.f32 %v1470_v42, %v2102_v15  ;;  %v485_v15 = vmul.f32 %v1462_v2, %v1991_v12 }
 0x3d8   : > { %v650_v49 = vpop.xlane.xlu1 %649  ;;  %v1101_v33 = vadd.f32 1e-05, %v1093_v51  ;;  %v493_v51 = vmul.f32 %v2204_v37, %v479_v14  ;;  %v498_v3 = vmul.f32 %v2204_v37, %v484_v24 }
 0x3d9   : > { %v641_v63 = vpop.xlane.xlu0 %640  ;;  %v658_v61 = vmul.f32 0.03125, %v650_v49  ;;  %v1472_v49 = vpop.eup %1471  ;;  %1497 = vrsqrt.f32 %v1104_v5  ;;  %v497_v11 = vmul.f32 %v2204_v37, %v483_v45  ;;  %v941_v54 = vmul.f32 %v2204_v37, %v933_v57 }
 0x3da   : > { %v655_v40 = vmul.f32 0.03125, %v641_v63  ;;  %v1474_v46 = vpop.eup %1473  ;;  %1499 = vrsqrt.f32 %v1101_v33  ;;  %v932_v10 = vmul.f32 %v1472_v49, %v2108_v20  ;;  %v2239_v25 = vadd.f32 %v2196_v62, %v493_v51 }
 0x3db   : > { %v666_v0 = vadd.f32 1e-05, %v658_v61  ;;  %v1476_v19 = vpop.eup %1475  ;;  %v486_v61 = vmul.f32 %v1468_v44, %v2003_v28  ;;  %v934_v29 = vmul.f32 %v1474_v46, %v2113_v23  ;;  %v2278_v45 = vadd.f32 %v2196_v62, %v941_v54 }
 0x3dc   : > { %v1090_v1 = vpop.xlane.xlu1 %1089  ;;  %v663_v47 = vadd.f32 1e-05, %v655_v40  ;;  %v1478_v16 = vpop.eup %1477  ;;  %v936_v17 = vmul.f32 %v1476_v19, %v2119_v56  ;;  %v496_v40 = vmul.f32 %v2204_v37, %v482_v4  ;;  %v921_v56 = vadd.f32 1e-05, %v913_v43 }
 0x3dd   : > { %v1081_v35 = vpop.xlane.xlu0 %1080  ;;  %v1098_v41 = vmul.f32 0.03125, %v1090_v1  ;;  %1501 = vrsqrt.f32 %v666_v0  ;;  %v2219_v32 = vpop.eup %1479  ;;  %v480_v1 = vmul.f32 %v1460_v55, %v1979_v6  ;;  %v495_v6 = vmul.f32 %v2204_v37, %v481_v60 }
 0x3de   : > { %v1095_v7 = vmul.f32 0.03125, %v1081_v35  ;;  %1503 = vrsqrt.f32 %v663_v47  ;;  %v1482_v58 = vpop.eup %1481  ;;  %v938_v28 = vmul.f32 %v1478_v16, %v2126_v30  ;;  %v500_v5 = vmul.f32 %v2204_v37, %v486_v61 }
 0x3df   : > { %v1106_v8 = vadd.f32 1e-05, %v1098_v41  ;;  %v1484_v26 = vpop.eup %1483  ;;  %v494_v36 = vmul.f32 %v2204_v37, %v480_v1  ;;  %v2248_v30 = vadd.f32 %v2196_v62, %v939_v50  ;;  %v940_v33 = vmul.f32 %v2204_v37, %v932_v10 }
 0x3e0   : > { %v1103_v63 = vadd.f32 1e-05, %v1095_v7  ;;  %v1486_v31 = vpop.eup %1485  ;;  %v935_v20 = vmul.f32 %v1484_v26, %v2165_v27  ;;  %v942_v12 = vmul.f32 %v2204_v37, %v934_v29  ;;  %v2254_v27 = vadd.f32 %v2196_v62, %v495_v6 }
 0x3e1   : > { %1505 = vrsqrt.f32 %v1106_v8  ;;  %v1488_v39 = vpop.eup %1487  ;;  %v2257_v7 = vadd.f32 %v2196_v62, %v497_v11  ;;  %v944_v44 = vmul.f32 %v2204_v37, %v936_v17  ;;  %v946_v0 = vmul.f32 %v2204_v37, %v938_v28 }
 0x3e2   : > { %1507 = vrsqrt.f32 %v1103_v63  ;;  %v1490_v35 = vpop.eup %1489  ;;  %v2262_v49 = vadd.f32 %v2196_v62, %v494_v36  ;;  %v2265_v8 = vmul.f32 %v2204_v37, %v485_v15  ;;  %v943_v46 = vmul.f32 %v2204_v37, %v935_v20  ;;  %v2502_v20 = vld [vmem:[#allocation12_spill] sm:$0xff] }
 0x3e3   : > { %v1492_v55 = vpop.eup %1491  ;;  %v2269_v14 = vadd.f32 %v2196_v62, %v496_v40  ;;  %v2272_v16 = vadd.f32 %v2196_v62, %v498_v3  ;;  %v2275_v48 = vadd.f32 %v2196_v62, %v500_v5  ;;  %1509 = vrsqrt.f32 %v921_v56  ;;  %v2504_v3 = vld [vmem:[#allocation14_spill] sm:$0xff] }
 0x3e4   : > { %v1494_v23 = vpop.eup %1493  ;;  %v2281_v26 = vadd.f32 %v2196_v62, %v940_v33  ;;  %v2284_v51 = vadd.f32 %v2196_v62, %v942_v12  ;;  %v2287_v24 = vadd.f32 %v2196_v62, %v944_v44  ;;  %v2290_v61 = vadd.f32 %v2196_v62, %v946_v0 }
 0x3e5   : > { %v1496_v41 = vpop.eup %1495  ;;  %v676_v43 = vmul.f32 %v2219_v32, %v2016_v53  ;;  %v1116_v50 = vmul.f32 %v1482_v58, %v2022_v59  ;;  %v2296_v29 = vadd.f32 %v2196_v62, %v943_v46  ;;  %v675_v6 = vmul.f32 %v1486_v31, %v2013_v52  ;;  %v2503_v31 = vld [vmem:[#allocation11_spill] sm:$0xff] }
 0x3e6   : > { %v1498_v2 = vpop.eup %1497  ;;  %v1118_v17 = vmul.f32 %v1488_v39, %v2044_v18  ;;  %v1115_v28 = vmul.f32 %v1490_v35, %v2035_v9  ;;  %v678_v36 = vmul.f32 %v1492_v55, %v2038_v13  ;;  %v680_v53 = vmul.f32 %v1494_v23, %v2062_v34  ;;  %v2505_v39 = vld [vmem:[#allocation13_spill] sm:$0xff] }
 0x3e7   : > { %v1500_v47 = vpop.eup %1499  ;;  %v677_v59 = vmul.f32 %v1496_v41, %v2053_v22  ;;  %v1120_v32 = vmul.f32 %v1498_v2, %v2068_v38 }
 0x3e8   : > { %v1117_v58 = vmul.f32 %v1500_v47, %v2049_v21  ;;  %v2316_v21 = vpop.permute.xlu1 %694 }
 0x3ea   : > { %v1502_v19 = vpop.eup %1501 }
 0x3eb   : > { %v1504_v60 = vpop.eup %1503  ;;  %v682_v52 = vmul.f32 %v1502_v19, %v2502_v20 }
 0x3ec   : > { %v679_v40 = vmul.f32 %v1504_v60, %v2503_v31 }
 0x3ee   : > { %v1506_v4 = vpop.eup %1505 }
 0x3ef   : > { %v1508_v10 = vpop.eup %1507  ;;  %v1122_v18 = vmul.f32 %v1506_v4, %v2504_v3 }
 0x3f0   : > { %v1119_v9 = vmul.f32 %v1508_v10, %v2505_v39 }
 0x413   : > { %v647_v42 = vpop.xlane.xlu0 %646 }
 0x414   : > { %v657_v63 = vmul.f32 0.03125, %v647_v42 }
 0x416   : > { %v665_v1 = vadd.f32 1e-05, %v657_v63 }
 0x417   : > { %v1087_v57 = vpop.xlane.xlu0 %1086 }
 0x418   : > { %1511 = vrsqrt.f32 %v665_v1  ;;  %v1097_v11 = vmul.f32 0.03125, %v1087_v57 }
 0x41a   : > { %v1105_v15 = vadd.f32 1e-05, %v1097_v11 }
 0x41b   : > { %v2310_v35 = vpop.permute.xlu0 %683 }
 0x41c   : > { %1513 = vrsqrt.f32 %v1105_v15  ;;  %v686_v13 = vmul.f32 %v2310_v35, %v675_v6  ;;  %v687_v22 = vmul.f32 %v2310_v35, %v676_v43  ;;  %v688_v34 = vmul.f32 %v2310_v35, %v677_v59  ;;  %v1510_v43 = vpop.eup %1509 }
 0x41d   : > { %v689_v38 = vmul.f32 %v2310_v35, %v678_v36  ;;  %v690_v55 = vmul.f32 %v2310_v35, %v679_v40  ;;  %v691_v23 = vmul.f32 %v2310_v35, %v680_v53  ;;  %v693_v5 = vmul.f32 %v2310_v35, %v682_v52 }
 0x41e   : > { %v1123_v56 = vmul.f32 %v1115_v28, %v2310_v35  ;;  %v1124_v41 = vmul.f32 %v1116_v50, %v2310_v35  ;;  %v1125_v54 = vmul.f32 %v1117_v58, %v2310_v35  ;;  %v1126_v33 = vmul.f32 %v1118_v17, %v2310_v35  ;;  %v2506_v28 = vld [vmem:[#allocation17_spill] sm:$0xff]  ;;  %v2507_v58 = vld [vmem:[#allocation15_spill] sm:$0xff] }
 0x41f   : > { %v1127_v12 = vmul.f32 %v1119_v9, %v2310_v35  ;;  %v1128_v2 = vmul.f32 %v1120_v32, %v2310_v35  ;;  %v1130_v44 = vmul.f32 %v1122_v18, %v2310_v35  ;;  %v697_v0 = vadd.f32 %v2316_v21, %v686_v13 }
 0x420   : > { %v698_v42 = vadd.f32 %v2316_v21, %v687_v22  ;;  %v699_v47 = vadd.f32 %v2316_v21, %v688_v34  ;;  %v700_v46 = vadd.f32 %v2316_v21, %v689_v38  ;;  %v701_v63 = vadd.f32 %v2316_v21, %v690_v55 }
 0x421   : > { %v702_v19 = vadd.f32 %v2316_v21, %v691_v23  ;;  %v704_v60 = vadd.f32 %v2316_v21, %v693_v5  ;;  %v705_v1 = vsel %vm381_vm1, %v2239_v25, %v697_v0  ;;  %v1131_v4 = vadd.f32 %v1123_v56, %v2316_v21 }
 0x422   : > { %v706_v50 = vsel %vm381_vm1, %v2262_v49, %v698_v42  ;;  %v707_v57 = vsel %vm381_vm1, %v2254_v27, %v699_v47  ;;  %v708_v10 = vsel %vm381_vm1, %v2269_v14, %v700_v46  ;;  %v709_v6 = vsel %vm381_vm1, %v2257_v7, %v701_v63  ;;  %713 = vst.msk [vmem:[%s2347_s29] sm:$0xff] %vm251_vm0, %v705_v1 }
 0x423   : > { %v710_v25 = vsel %vm381_vm1, %v2272_v16, %v702_v19  ;;  %v712_v27 = vsel %vm381_vm1, %v2275_v48, %v704_v60  ;;  %714 = vst.msk [vmem:[%s2347_s29 + $0x10] sm:$0xff] %vm251_vm0, %v706_v50  ;;  %715 = vst.msk [vmem:[%s2347_s29 + $0x20] sm:$0xff] %vm251_vm0, %v707_v57  ;;  %v1132_v7 = vadd.f32 %v1124_v41, %v2316_v21 }
 0x424   : > { %716 = vst.msk [vmem:[%s2347_s29 + $0x30] sm:$0xff] %vm251_vm0, %v708_v10  ;;  %717 = vst.msk [vmem:[%s2347_s29 + $0x40] sm:$0xff] %vm251_vm0, %v709_v6  ;;  %v1133_v49 = vadd.f32 %v1125_v54, %v2316_v21  ;;  %v1134_v14 = vadd.f32 %v1126_v33, %v2316_v21  ;;  %v1135_v16 = vadd.f32 %v1127_v12, %v2316_v21 }
 0x425   : > { %718 = vst.msk [vmem:[%s2347_s29 + $0x50] sm:$0xff] %vm251_vm0, %v710_v25  ;;  %720 = vst.msk [vmem:[%s2347_s29 + $0x70] sm:$0xff] %vm251_vm0, %v712_v27  ;;  %v1136_v48 = vadd.f32 %v1128_v2, %v2316_v21  ;;  %v1138_v11 = vadd.f32 %v1130_v44, %v2316_v21  ;;  %v1512_v17 = vpop.eup %1511  ;;  %v937_v36 = vmul.f32 %v1510_v43, %v2506_v28 }
 0x426   : > { %v1139_v53 = vsel %vm381_vm1, %v2248_v30, %v1131_v4  ;;  %v1140_v59 = vsel %vm381_vm1, %v2281_v26, %v1132_v7  ;;  %v1141_v32 = vsel %vm381_vm1, %v2278_v45, %v1133_v49  ;;  %v681_v15 = vmul.f32 %v1512_v17, %v2507_v58 }
 0x427   : > { %v1142_v20 = vsel %vm381_vm1, %v2284_v51, %v1134_v14  ;;  %v1143_v52 = vsel %vm381_vm1, %v2296_v29, %v1135_v16  ;;  %v1144_v31 = vsel %vm381_vm1, %v2287_v24, %v1136_v48  ;;  %1283 = vst.msk [vmem:[%s2347_s29 + $0x8] sm:$0xff] %vm251_vm0, %v1139_v53  ;;  %1284 = vst.msk [vmem:[%s2347_s29 + $0x18] sm:$0xff] %vm251_vm0, %v1140_v59  ;;  %v2508_v29 = vld [vmem:[#allocation16_spill] sm:$0xff] }
 0x428   : > { %1285 = vst.msk [vmem:[%s2347_s29 + $0x28] sm:$0xff] %vm251_vm0, %v1141_v32  ;;  %v1146_v30 = vsel %vm381_vm1, %v2290_v61, %v1138_v11  ;;  %1286 = vst.msk [vmem:[%s2347_s29 + $0x38] sm:$0xff] %vm251_vm0, %v1142_v20  ;;  %v692_v45 = vmul.f32 %v2310_v35, %v681_v15  ;;  %v513_v51 = vadd.f32 %v2196_v62, %v2265_v8 }
 0x429   : > { %1287 = vst.msk [vmem:[%s2347_s29 + $0x48] sm:$0xff] %vm251_vm0, %v1143_v52  ;;  %1288 = vst.msk [vmem:[%s2347_s29 + $0x58] sm:$0xff] %vm251_vm0, %v1144_v31  ;;  %v1514_v26 = vpop.eup %1513  ;;  %v945_v24 = vmul.f32 %v2204_v37, %v937_v36 }
 0x42a   : > { %1290 = vst.msk [vmem:[%s2347_s29 + $0x78] sm:$0xff] %vm251_vm0, %v1146_v30  ;;  %v1121_v61 = vmul.f32 %v1514_v26, %v2508_v29  ;;  %v703_v40 = vadd.f32 %v2316_v21, %v692_v45 }
 0x42b   : > { %v953_v39 = vadd.f32 %v2196_v62, %v945_v24 }
 0x42c   : > { %v1129_v3 = vmul.f32 %v1121_v61, %v2310_v35  ;;  %v711_v18 = vsel %vm381_vm1, %v513_v51, %v703_v40 }
 0x42d   : > { %719 = vst.msk [vmem:[%s2347_s29 + $0x60] sm:$0xff] %vm251_vm0, %v711_v18 }
 0x42e   : > { %v1137_v9 = vadd.f32 %v1129_v3, %v2316_v21 }
 0x430   : > { %v1145_v37 = vsel %vm381_vm1, %v953_v39, %v1137_v9 }
 0x431   : > { %1289 = vst.msk [vmem:[%s2347_s29 + $0x68] sm:$0xff] %vm251_vm0, %v1145_v37 }
 0x432   : > { %1582 = shalt.err (!%p1579_p0)
}
 0x433   : > { %s1583_s23 = scalar_lea.hbm %s2420_s7, 2048  ;;  %s1587_s24 = scalar_lea.hbm %s2472_s4, 4096 }
 0x434   : > { %p1584_p5 = scmp.ne.s32.totalorder %s2420_s7, %s1583_s23  ;;  %p1588_p4 = scmp.lt.s32.totalorder %s2420_s7, %s2472_s4 }
 0x435   : > { %p1589_p6 = scmp.lt.s32.totalorder %s1587_s24, %s1583_s23 }
 0x436   : > { %p1585_p2 = pnand %p1584_p5, %p2509_p11 }
 0x437   : > { %p1590_p8 = por %p1589_p6, %p1588_p4 }
 0x438   : > { %p1586_p1 = pneg %p1585_p2 }
 0x43a   : > { %p1591_p3 = pnand %p1590_p8, %p1586_p1 }
 0x43c   : > { %1594 = shalt.err (!%p1591_p3)
}
 0x43d   : > { %s1646_s29 = smov 128   ;;  %s1647_s14 = smov 8  }
 0x43e   : > { %1394 = dma.vmem_to_hbm [thread:$0]  (%p2509_p11), %s2422_s11, 2048, %s2420_s7, %s1157_s19, %s1646_s29, %s1646_s29, %s1647_s14  }
 0x43f PF: > { %s1186_s20 = sand.u32 1, %s1625_s15   ;;  %p2510_p7 = scmp.ne.s32.totalorder %s2485_s22, 0 }
 0x440   : > { %p2511_p9 = scmp.ge.s32.totalorder %s1637_s18, 2  ;;  %s1187_s25 = scalar_lea.sflag [#allocation4], %s1186_s20 }
 0x442   : > { %p1405_p10 = pnand %p2511_p9, %p2510_p7 }
 0x444   : > { %p1406_p12 = pneg %p1405_p10 }
 0x446   : > { %1620 = dma.done.wait (%p1406_p12), %s1187_s25, 2048  }
 0x447   : > { %1622 = vsyncadd (%p1406_p12), %s1187_s25, 4294965248  ;;  %p18_p13 = scmp.ge.s32.totalorder %s1727_s27, 4   ;;  %s2512_s15 = smov %s1629_s16 }
 0x448   : > { %s2513_s16 = smov %s1633_s17  ;;  %s2514_s17 = smov %s1747_s9 }
 0x449   : > { %s2515_s18 = smov %s1727_s27  ;;  %20 = sbr.rel (!%p18_p13) target bundleno = 6 (0x6), region = 87 }
 0x44e   :  { %1192 = vsyncpa [#allocation3], 1 }
 0x44f   :  { %1194 = vsyncpa [#allocation3 + $0x1], 1 }
 0x450   :  { %1195 = vsyncpa [#allocation6], 1 }
 0x451   :  { %1196 = vsyncpa [#allocation4], 1 }
 0x452   :  { %1198 = vsyncpa [#allocation4 + $0x1], 1 }

</bundles_post_ra>
